<compile_context>
chip_gen: v6e
topology: v6e:2x2x1
jax: 0.10.0
libtpu: 0.0.40
codegen_flags: <defaults>
</compile_context>

<pallas_src>
import functools
import math

import jax
import jax.numpy as jnp
from jax.experimental import pallas as pl
from jax.experimental.pallas import tpu as pltpu


def _round_up(a, m):
    return (a + m - 1) // m * m


def _pick_tile(total, preferred, unit):
    """Largest multiple of `unit` <= preferred that divides `total` (total % unit == 0)."""
    t = max(unit, (min(preferred, total) // unit) * unit)
    while total % t:
        t -= unit
    return t


def _kan_kernel(x_ref, tbl_ref, w_ref, out_ref, feats_ref, *,
                spline_order, n_knots, in_pad, n_coeff):
    """One (tile_n, tile_out) output block.

    Grid = (row_tiles OUTER "parallel", out_tiles INNER "arbitrary").  The
    SiLU + Cox-de Boor feature slab is built once per row tile (inner index
    == 0), stored into the persistent `feats_ref` VMEM scratch and reused by
    every out tile of that row block; each inner step is a single fused MXU
    contraction.

    x_ref    : (tile_n, in_pad)            f32 activations (lane dim = feature)
    tbl_ref  : (n_knots + n_inv, in_pad)   f32 knots + knot-diff reciprocals
    w_ref    : ((C+1)*in_pad, tile_out)    fused [base ; spline*scaler] weights
    out_ref  : (tile_n, tile_out)          f32
    feats_ref: (tile_n, (C+1)*in_pad)      VMEM scratch, weight dtype
    """

    @pl.when(pl.program_id(1) == 0)
    def _build_feats():
        x = x_ref[...]
        tbl = tbl_ref[...]                                   # small table, load once
        g = [tbl[j:j + 1, :] for j in range(n_knots)]        # (1, in_pad) knot rows

        # Base branch: SiLU(x) -> lane slice 0 of feats (cast at the store).
        feats_ref[:, 0:in_pad] = (x * jax.nn.sigmoid(x)).astype(feats_ref.dtype)

        # Degree-0 bases from shared comparisons:
        #   (x >= g[j]) & (x < g[j+1])  ==  cmp[j] - cmp[j+1]   (knots monotone)
        cmp = [(x >= g[j]).astype(jnp.float32) for j in range(n_knots)]
        bases = [cmp[j] - cmp[j + 1] for j in range(n_knots - 1)]

        # Cox-de Boor recursion.  Knot-difference reciprocals are precomputed
        # rows of `tbl` (static per layer), so full-tile work is mul/add only
        # (EUP stays free for the sigmoid above).
        row = n_knots
        for k in range(1, spline_order + 1):
            nxt = []
            for j in range(len(bases) - 1):
                inv_a = tbl[row:row + 1, :]
                inv_b = tbl[row + 1:row + 2, :]
                row += 2
                nxt.append((x - g[j]) * inv_a * bases[j]
                           + (g[j + k + 1] - x) * inv_b * bases[j + 1])
            bases = nxt
        assert len(bases) == n_coeff

        # Final-degree bases -> lane slices 1..C of feats (lane-aligned stores).
        for m in range(n_coeff):
            feats_ref[:, (m + 1) * in_pad:(m + 2) * in_pad] = (
                bases[m].astype(feats_ref.dtype))

    # Single fused MXU contraction over K = (C+1)*in_pad; f32 accumulation.
    out_ref[...] = jnp.dot(
        feats_ref[...], w_ref[...],
        preferred_element_type=jnp.float32).astype(out_ref.dtype)


def prepare_kan_params(grid, base_weight, spline_weight, spline_scaler,
                       spline_order, *, weight_dtype=jnp.bfloat16):
    """One-time parameter prep (transpose / scaler fold / reciprocals / pad / cast).

    Done once outside the forward hot path so forward streams a single fused,
    lane-dense weight slab plus a small knot/reciprocal table.
    """
    out_features, in_features, n_coeff = spline_weight.shape
    n_knots = grid.shape[1]
    in_pad = _round_up(in_features, 128)
    out_pad = _round_up(out_features, 128)

    # Knots, feature-minor: (n_knots, in_pad).  Padded feature columns replicate
    # the last real feature's knots (nonzero knot differences -> finite
    # reciprocals); their weight rows are zero so they contribute nothing.
    grid_t = jnp.transpose(grid).astype(jnp.float32)
    if in_pad > in_features:
        grid_t = jnp.concatenate(
            [grid_t,
             jnp.broadcast_to(grid_t[:, -1:], (n_knots, in_pad - in_features))],
            axis=1)

    # Precompute knot-difference reciprocals for every Cox-de Boor step, in the
    # exact order the kernel consumes them.
    inv_rows = []
    count = n_knots - 1
    for k in range(1, spline_order + 1):
        for j in range(count - 1):
            inv_rows.append(1.0 / (grid_t[j + k] - grid_t[j]))
            inv_rows.append(1.0 / (grid_t[j + k + 1] - grid_t[j + 1]))
        count -= 1
    inv_t = (jnp.stack(inv_rows, axis=0) if inv_rows
             else jnp.zeros((0, in_pad), jnp.float32))
    tbl = jnp.concatenate([grid_t, inv_t], axis=0)

    # Base weight: (out, in) -> (in_pad, out_pad), zero padded.
    base_w = jnp.transpose(base_weight).astype(jnp.float32)
    base_w = jnp.pad(base_w,
                     ((0, in_pad - in_features), (0, out_pad - out_features)))

    # Spline weight with standalone scaler folded in:
    # (out, in, C) -> (C, in_pad, out_pad) -> (C*in_pad, out_pad).
    sw = spline_weight * spline_scaler[:, :, None] if spline_scaler is not None \
        else spline_weight
    sw = jnp.transpose(sw, (2, 1, 0)).astype(jnp.float32)
    sw = jnp.pad(sw, ((0, 0), (0, in_pad - in_features),
                      (0, out_pad - out_features)))
    sw = sw.reshape(n_coeff * in_pad, out_pad)

    # Fused slab: rows [0:in_pad) = base weight, rows [in_pad:) = spline weight.
    w_all = jnp.concatenate([base_w, sw], axis=0).astype(weight_dtype)

    return {
        "tbl": tbl,
        "w_all": w_all,
        "in_features": in_features,
        "in_pad": in_pad,
        "out_features": out_features,
        "out_pad": out_pad,
        "n_coeff": n_coeff,
        "n_knots": n_knots,
        "spline_order": spline_order,
    }


def kan_linear_forward(x, params, *, tile_n=None, tile_out=None,
                       vmem_budget_bytes=36 << 20):
    """Pallas KANLinear.forward.  x: (..., in_features) -> (..., out_features)."""
    in_features = params["in_features"]
    in_pad = params["in_pad"]
    out_features = params["out_features"]
    out_pad = params["out_pad"]
    n_coeff = params["n_coeff"]
    n_knots = params["n_knots"]
    spline_order = params["spline_order"]
    tbl = params["tbl"]
    w_all = params["w_all"]

    K = (n_coeff + 1) * in_pad
    w_itemsize = jnp.dtype(w_all.dtype).itemsize
    tbl_rows = tbl.shape[0]

    orig_shape = x.shape
    x2 = x.reshape(-1, in_features).astype(jnp.float32)
    n = x2.shape[0]
    n_unit = _round_up(max(n, 1), 8)

    def footprint(tn, to):
        # Pipelined buffers are double-buffered; the Cox-de Boor term is a
        # coarse upper bound on live (tn, in_pad) f32 temporaries.
        x_buf = 2 * tn * in_pad * 4
        w_buf = 2 * K * to * w_itemsize
        o_buf = 2 * tn * to * 4
        feats = tn * K * w_itemsize
        tbl_buf = 2 * tbl_rows * in_pad * 4
        inter = (2 * n_knots + 2) * tn * in_pad * 4
        return x_buf + w_buf + o_buf + feats + tbl_buf + inter

    # ---- Tile selection against a cross-generation VMEM budget --------------
    if tile_n is None:
        tile_n = min(256, n_unit)            # 256-row LHS fills v6e/v7x MXUs
    if tile_out is None:
        tile_out = out_pad                   # keep weight slab resident if it fits
        while footprint(tile_n, tile_out) > vmem_budget_bytes and tile_out > 128:
            tile_out = _pick_tile(out_pad, tile_out // 2, 128)
        while footprint(tile_n, tile_out) > vmem_budget_bytes and tile_n > 64:
            tile_n = max(64, tile_n // 2)
        if tile_out < out_pad:
            # Weights now stream along the inner axis: grow the row tile so the
            # per-step weight DMA hides under the MXU.
            grown = min(512, n_unit)
            if grown > tile_n and footprint(grown, tile_out) <= vmem_budget_bytes:
                tile_n = grown
    tile_n = max(8, _round_up(min(tile_n, n_unit), 8))
    tile_out = _pick_tile(out_pad, tile_out, 128)
    # TODO(synk): for very wide layers (in_pad >= ~1024 on v7x) add a third
    # "arbitrary" grid axis chunking the feature dimension with an f32 VMEM
    # accumulator (pl.when init/finalize) to bound the Cox-de Boor temporaries.
    # TODO(synk): when the weight slab is resident (out_tiles == 1), a
    # pipeline_mode=pl.Buffered(1) weight BlockSpec would halve its VMEM cost.

    n_pad = _round_up(n, tile_n)
    x2p = jnp.pad(x2, ((0, n_pad - n), (0, in_pad - in_features)))

    row_tiles = n_pad // tile_n
    out_tiles = out_pad // tile_out

    # Explicit scoped-VMEM limit from the real footprint (defaults are only
    # 16 MiB on v5e / 32 MiB on v6e & v7x); stays under v7x's 64 MiB physical.
    fp = footprint(tile_n, tile_out)
    vmem_limit = int(min(max(fp * 3 // 2, 32 << 20), 50 << 20))

    kernel = functools.partial(_kan_kernel, spline_order=spline_order,
                               n_knots=n_knots, in_pad=in_pad, n_coeff=n_coeff)

    flops = 2 * n_pad * K * out_pad
    # Weight slab is VMEM-resident when out_tiles == 1, else re-streamed per row tile.
    w_hbm_reads = 1 if out_tiles == 1 else row_tiles
    bytes_accessed = (n_pad * in_pad * 4
                      + tbl.size * 4
                      + w_hbm_reads * w_all.size * w_itemsize
                      + n_pad * out_pad * 4)

    out = pl.pallas_call(
        kernel,
        out_shape=jax.ShapeDtypeStruct((n_pad, out_pad), jnp.float32),
        grid_spec=pltpu.PrefetchScalarGridSpec(
            num_scalar_prefetch=0,
            # Row tiles OUTER ("parallel", megacore-shardable), out tiles INNER
            # ("arbitrary") so the feats scratch cache is legal and the
            # B-spline work runs once per row tile.
            grid=(row_tiles, out_tiles),
            in_specs=[
                pl.BlockSpec((tile_n, in_pad), lambda i, j: (i, 0)),      # x
                pl.BlockSpec((tbl_rows, in_pad), lambda i, j: (0, 0)),    # knots+inv
                pl.BlockSpec((K, tile_out), lambda i, j: (0, j)),         # weights
            ],
            out_specs=pl.BlockSpec((tile_n, tile_out), lambda i, j: (i, j)),
            scratch_shapes=[pltpu.VMEM((tile_n, K), w_all.dtype)],        # feats
        ),
        compiler_params=pltpu.CompilerParams(
            dimension_semantics=("parallel", "arbitrary"),
            vmem_limit_bytes=vmem_limit),
        cost_estimate=pl.CostEstimate(
            flops=flops,
            transcendentals=n_pad * in_pad,          # sigmoid, once per row tile
            bytes_accessed=bytes_accessed),
    )(x2p, tbl, w_all)

    return out[:n, :out_features].reshape(*orig_shape[:-1], out_features)


def ref_forward(x, grid, base_weight, spline_weight, spline_scaler, spline_order):
    """Pure-JAX f32 reference mirroring the PyTorch module (correctness check)."""
    out_features, in_features = base_weight.shape
    xs = x.reshape(-1, in_features).astype(jnp.float32)
    xe = xs[:, :, None]
    bases = jnp.logical_and(xe >= grid[:, :-1], xe < grid[:, 1:]).astype(xs.dtype)
    for k in range(1, spline_order + 1):
        bases = ((xe - grid[:, :-(k + 1)]) / (grid[:, k:-1] - grid[:, :-(k + 1)])
                 * bases[:, :, :-1]
                 + (grid[:, k + 1:] - xe) / (grid[:, k + 1:] - grid[:, 1:-k])
                 * bases[:, :, 1:])
    silu = xs * jax.nn.sigmoid(xs)
    base_out = silu @ base_weight.T
    scaled_w = spline_weight * spline_scaler[:, :, None]
    spline_out = bases.reshape(xs.shape[0], -1) @ scaled_w.reshape(out_features, -1).T
    out = base_out + spline_out
    return out.reshape(*x.shape[:-1], out_features)


if __name__ == "__main__":
    # Small, deterministic configuration consistent with the module defaults.
    in_features = 16
    out_features = 32
    grid_size = 5
    spline_order = 3
    grid_range = (-1.0, 1.0)

    key = jax.random.PRNGKey(0)
    k_x, k_bw, k_sw, k_sc = jax.random.split(key, 4)

    # Grid buffer exactly as in __init__ (uniform knots expanded per input feature).
    h = (grid_range[1] - grid_range[0]) / grid_size
    knots = (jnp.arange(-spline_order, grid_size + spline_order + 1,
                        dtype=jnp.float32) * h + grid_range[0])
    grid = jnp.broadcast_to(knots, (in_features, knots.shape[0]))

    # Deterministic parameter init (same shapes/semantics as the PyTorch module).
    # TODO(synk): torch's kaiming_uniform_ / curve2coeff (linalg.solve) init is not
    # reproduced bit-for-bit; the forward-pass math is.
    bound = 1.0 / math.sqrt(in_features)
    base_weight = jax.random.uniform(
        k_bw, (out_features, in_features), jnp.float32, -bound, bound)
    spline_weight = 0.1 * jax.random.normal(
        k_sw, (out_features, in_features, grid_size + spline_order), jnp.float32)
    spline_scaler = jax.random.uniform(
        k_sc, (out_features, in_features), jnp.float32, 0.5, 1.5)

    # Example input: (batch, seq, in_features), flattened inside forward.
    x = jax.random.uniform(k_x, (2, 8, in_features), jnp.float32, -0.95, 0.95)

    expected = ref_forward(x, grid, base_weight, spline_weight, spline_scaler,
                           spline_order)

    # 1) f32-weight path: tight check against the f32 reference.
    params_f32 = prepare_kan_params(grid, base_weight, spline_weight, spline_scaler,
                                    spline_order, weight_dtype=jnp.float32)
    out_f32 = jax.block_until_ready(kan_linear_forward(x, params_f32))
    assert out_f32.shape == (2, 8, out_features), out_f32.shape
    assert jnp.allclose(out_f32, expected, atol=1e-3, rtol=1e-3), \
        float(jnp.max(jnp.abs(out_f32 - expected)))

    # 2) Default bf16-operand MXU path (f32 accumulation): looser tolerance.
    params_bf16 = prepare_kan_params(grid, base_weight, spline_weight, spline_scaler,
                                     spline_order, weight_dtype=jnp.bfloat16)
    out_bf16 = jax.block_until_ready(kan_linear_forward(x, params_bf16))
    assert out_bf16.shape == (2, 8, out_features), out_bf16.shape
    assert jnp.allclose(out_bf16, expected, atol=3e-2, rtol=3e-2), \
        float(jnp.max(jnp.abs(out_bf16 - expected)))

    print("KERNEL_OK")
</pallas_src>

<mosaic_0001>
module attributes {stable_mosaic.version = 11 : i64} {
  func.func @_kan_kernel(%arg0: i32, %arg1: i32, %arg2: memref<16x128xf32, #tpu.memory_space<vmem>>, %arg3: memref<66x128xf32, #tpu.memory_space<vmem>>, %arg4: memref<1152x128xf32, #tpu.memory_space<vmem>>, %arg5: memref<16x128xf32, #tpu.memory_space<vmem>>, %arg6: memref<16x1152xf32, #tpu.memory_space<vmem>>) attributes {dimension_semantics = [#tpu.dimension_semantics<parallel>, #tpu.dimension_semantics<arbitrary>], iteration_bounds = array<i64: 1, 1>, scalar_prefetch = 0 : i64, scratch_operands = 1 : i64, tpu.core_type = #tpu.core_type<tc>, window_params = [{transform_indices = @transform_0, window_bounds = array<i64: 16, 128>}, {pipeline_mode = #tpu.pipeline_mode<synchronous>, transform_indices = @transform_1, window_bounds = array<i64: 66, 128>}, {transform_indices = @transform_2, window_bounds = array<i64: 1152, 128>}, {transform_indices = @transform_3, window_bounds = array<i64: 16, 128>}]} {
    %c0_i32 = arith.constant 0 : i32
    %0 = arith.cmpi eq, %arg1, %c0_i32 : i32
    %1 = arith.extui %0 : i1 to i32
    %c0_i32_0 = arith.constant 0 : i32
    %2 = arith.cmpi ne, %1, %c0_i32_0 : i32
    scf.if %2 {
      %c0_6 = arith.constant 0 : index
      %c0_7 = arith.constant 0 : index
      %7 = vector.load %arg2[%c0_6, %c0_7] : memref<16x128xf32, #tpu.memory_space<vmem>>, vector<16x128xf32>
      %c0_8 = arith.constant 0 : index
      %c0_9 = arith.constant 0 : index
      %8 = vector.load %arg3[%c0_8, %c0_9] : memref<66x128xf32, #tpu.memory_space<vmem>>, vector<66x128xf32>
      %9 = vector.extract_strided_slice %8 {offsets = [0, 0], sizes = [1, 128], strides = [1, 1]} : vector<66x128xf32> to vector<1x128xf32>
      %10 = vector.extract_strided_slice %8 {offsets = [1, 0], sizes = [1, 128], strides = [1, 1]} : vector<66x128xf32> to vector<1x128xf32>
      %11 = vector.extract_strided_slice %8 {offsets = [2, 0], sizes = [1, 128], strides = [1, 1]} : vector<66x128xf32> to vector<1x128xf32>
      %12 = vector.extract_strided_slice %8 {offsets = [3, 0], sizes = [1, 128], strides = [1, 1]} : vector<66x128xf32> to vector<1x128xf32>
      %13 = vector.extract_strided_slice %8 {offsets = [4, 0], sizes = [1, 128], strides = [1, 1]} : vector<66x128xf32> to vector<1x128xf32>
      %14 = vector.extract_strided_slice %8 {offsets = [5, 0], sizes = [1, 128], strides = [1, 1]} : vector<66x128xf32> to vector<1x128xf32>
      %15 = vector.extract_strided_slice %8 {offsets = [6, 0], sizes = [1, 128], strides = [1, 1]} : vector<66x128xf32> to vector<1x128xf32>
      %16 = vector.extract_strided_slice %8 {offsets = [7, 0], sizes = [1, 128], strides = [1, 1]} : vector<66x128xf32> to vector<1x128xf32>
      %17 = vector.extract_strided_slice %8 {offsets = [8, 0], sizes = [1, 128], strides = [1, 1]} : vector<66x128xf32> to vector<1x128xf32>
      %18 = vector.extract_strided_slice %8 {offsets = [9, 0], sizes = [1, 128], strides = [1, 1]} : vector<66x128xf32> to vector<1x128xf32>
      %19 = vector.extract_strided_slice %8 {offsets = [10, 0], sizes = [1, 128], strides = [1, 1]} : vector<66x128xf32> to vector<1x128xf32>
      %20 = vector.extract_strided_slice %8 {offsets = [11, 0], sizes = [1, 128], strides = [1, 1]} : vector<66x128xf32> to vector<1x128xf32>
      %21 = arith.negf %7 : vector<16x128xf32>
      %22 = math.exp %21 : vector<16x128xf32>
      %cst_10 = arith.constant 1.000000e+00 : f32
      %23 = vector.broadcast %cst_10 : f32 to vector<16x128xf32>
      %24 = arith.addf %23, %22 : vector<16x128xf32>
      %25 = arith.divf %23, %24 : vector<16x128xf32>
      %26 = arith.mulf %7, %25 : vector<16x128xf32>
      %c0_11 = arith.constant 0 : index
      %c0_12 = arith.constant 0 : index
      %27 = vector.load %arg6[%c0_11, %c0_12] : memref<16x1152xf32, #tpu.memory_space<vmem>>, vector<16x128xf32>
      tpu.vector_store %arg6[%c0_11, %c0_12], %26 {strides = array<i32>} : memref<16x1152xf32, #tpu.memory_space<vmem>>, vector<16x128xf32>,
      %28 = vector.broadcast %9 : vector<1x128xf32> to vector<16x128xf32>
      %29 = arith.cmpf oge, %7, %28 : vector<16x128xf32>
      %30 = arith.extui %29 : vector<16x128xi1> to vector<16x128xi32>
      %31 = arith.sitofp %30 : vector<16x128xi32> to vector<16x128xf32>
      %32 = vector.broadcast %10 : vector<1x128xf32> to vector<16x128xf32>
      %33 = arith.cmpf oge, %7, %32 : vector<16x128xf32>
      %34 = arith.extui %33 : vector<16x128xi1> to vector<16x128xi32>
      %35 = arith.sitofp %34 : vector<16x128xi32> to vector<16x128xf32>
      %36 = vector.broadcast %11 : vector<1x128xf32> to vector<16x128xf32>
      %37 = arith.cmpf oge, %7, %36 : vector<16x128xf32>
      %38 = arith.extui %37 : vector<16x128xi1> to vector<16x128xi32>
      %39 = arith.sitofp %38 : vector<16x128xi32> to vector<16x128xf32>
      %40 = vector.broadcast %12 : vector<1x128xf32> to vector<16x128xf32>
      %41 = arith.cmpf oge, %7, %40 : vector<16x128xf32>
      %42 = arith.extui %41 : vector<16x128xi1> to vector<16x128xi32>
      %43 = arith.sitofp %42 : vector<16x128xi32> to vector<16x128xf32>
      %44 = vector.broadcast %13 : vector<1x128xf32> to vector<16x128xf32>
      %45 = arith.cmpf oge, %7, %44 : vector<16x128xf32>
      %46 = arith.extui %45 : vector<16x128xi1> to vector<16x128xi32>
      %47 = arith.sitofp %46 : vector<16x128xi32> to vector<16x128xf32>
      %48 = vector.broadcast %14 : vector<1x128xf32> to vector<16x128xf32>
      %49 = arith.cmpf oge, %7, %48 : vector<16x128xf32>
      %50 = arith.extui %49 : vector<16x128xi1> to vector<16x128xi32>
      %51 = arith.sitofp %50 : vector<16x128xi32> to vector<16x128xf32>
      %52 = vector.broadcast %15 : vector<1x128xf32> to vector<16x128xf32>
      %53 = arith.cmpf oge, %7, %52 : vector<16x128xf32>
      %54 = arith.extui %53 : vector<16x128xi1> to vector<16x128xi32>
      %55 = arith.sitofp %54 : vector<16x128xi32> to vector<16x128xf32>
      %56 = vector.broadcast %16 : vector<1x128xf32> to vector<16x128xf32>
      %57 = arith.cmpf oge, %7, %56 : vector<16x128xf32>
      %58 = arith.extui %57 : vector<16x128xi1> to vector<16x128xi32>
      %59 = arith.sitofp %58 : vector<16x128xi32> to vector<16x128xf32>
      %60 = vector.broadcast %17 : vector<1x128xf32> to vector<16x128xf32>
      %61 = arith.cmpf oge, %7, %60 : vector<16x128xf32>
      %62 = arith.extui %61 : vector<16x128xi1> to vector<16x128xi32>
      %63 = arith.sitofp %62 : vector<16x128xi32> to vector<16x128xf32>
      %64 = vector.broadcast %18 : vector<1x128xf32> to vector<16x128xf32>
      %65 = arith.cmpf oge, %7, %64 : vector<16x128xf32>
      %66 = arith.extui %65 : vector<16x128xi1> to vector<16x128xi32>
      %67 = arith.sitofp %66 : vector<16x128xi32> to vector<16x128xf32>
      %68 = vector.broadcast %19 : vector<1x128xf32> to vector<16x128xf32>
      %69 = arith.cmpf oge, %7, %68 : vector<16x128xf32>
      %70 = arith.extui %69 : vector<16x128xi1> to vector<16x128xi32>
      %71 = arith.sitofp %70 : vector<16x128xi32> to vector<16x128xf32>
      %72 = vector.broadcast %20 : vector<1x128xf32> to vector<16x128xf32>
      %73 = arith.cmpf oge, %7, %72 : vector<16x128xf32>
      %74 = arith.extui %73 : vector<16x128xi1> to vector<16x128xi32>
      %75 = arith.sitofp %74 : vector<16x128xi32> to vector<16x128xf32>
      %76 = arith.subf %31, %35 : vector<16x128xf32>
      %77 = arith.subf %35, %39 : vector<16x128xf32>
      %78 = arith.subf %39, %43 : vector<16x128xf32>
      %79 = arith.subf %43, %47 : vector<16x128xf32>
      %80 = arith.subf %47, %51 : vector<16x128xf32>
      %81 = arith.subf %51, %55 : vector<16x128xf32>
      %82 = arith.subf %55, %59 : vector<16x128xf32>
      %83 = arith.subf %59, %63 : vector<16x128xf32>
      %84 = arith.subf %63, %67 : vector<16x128xf32>
      %85 = arith.subf %67, %71 : vector<16x128xf32>
      %86 = arith.subf %71, %75 : vector<16x128xf32>
      %87 = vector.extract_strided_slice %8 {offsets = [12, 0], sizes = [1, 128], strides = [1, 1]} : vector<66x128xf32> to vector<1x128xf32>
      %88 = vector.extract_strided_slice %8 {offsets = [13, 0], sizes = [1, 128], strides = [1, 1]} : vector<66x128xf32> to vector<1x128xf32>
      %89 = vector.broadcast %9 : vector<1x128xf32> to vector<16x128xf32>
      %90 = arith.subf %7, %89 : vector<16x128xf32>
      %91 = vector.broadcast %87 : vector<1x128xf32> to vector<16x128xf32>
      %92 = arith.mulf %90, %91 : vector<16x128xf32>
      %93 = arith.mulf %92, %76 : vector<16x128xf32>
      %94 = vector.broadcast %11 : vector<1x128xf32> to vector<16x128xf32>
      %95 = arith.subf %94, %7 : vector<16x128xf32>
      %96 = vector.broadcast %88 : vector<1x128xf32> to vector<16x128xf32>
      %97 = arith.mulf %95, %96 : vector<16x128xf32>
      %98 = arith.mulf %97, %77 : vector<16x128xf32>
      %99 = arith.addf %93, %98 : vector<16x128xf32>
      %100 = vector.extract_strided_slice %8 {offsets = [14, 0], sizes = [1, 128], strides = [1, 1]} : vector<66x128xf32> to vector<1x128xf32>
      %101 = vector.extract_strided_slice %8 {offsets = [15, 0], sizes = [1, 128], strides = [1, 1]} : vector<66x128xf32> to vector<1x128xf32>
      %102 = vector.broadcast %10 : vector<1x128xf32> to vector<16x128xf32>
      %103 = arith.subf %7, %102 : vector<16x128xf32>
      %104 = vector.broadcast %100 : vector<1x128xf32> to vector<16x128xf32>
      %105 = arith.mulf %103, %104 : vector<16x128xf32>
      %106 = arith.mulf %105, %77 : vector<16x128xf32>
      %107 = vector.broadcast %12 : vector<1x128xf32> to vector<16x128xf32>
      %108 = arith.subf %107, %7 : vector<16x128xf32>
      %109 = vector.broadcast %101 : vector<1x128xf32> to vector<16x128xf32>
      %110 = arith.mulf %108, %109 : vector<16x128xf32>
      %111 = arith.mulf %110, %78 : vector<16x128xf32>
      %112 = arith.addf %106, %111 : vector<16x128xf32>
      %113 = vector.extract_strided_slice %8 {offsets = [16, 0], sizes = [1, 128], strides = [1, 1]} : vector<66x128xf32> to vector<1x128xf32>
      %114 = vector.extract_strided_slice %8 {offsets = [17, 0], sizes = [1, 128], strides = [1, 1]} : vector<66x128xf32> to vector<1x128xf32>
      %115 = vector.broadcast %11 : vector<1x128xf32> to vector<16x128xf32>
      %116 = arith.subf %7, %115 : vector<16x128xf32>
      %117 = vector.broadcast %113 : vector<1x128xf32> to vector<16x128xf32>
      %118 = arith.mulf %116, %117 : vector<16x128xf32>
      %119 = arith.mulf %118, %78 : vector<16x128xf32>
      %120 = vector.broadcast %13 : vector<1x128xf32> to vector<16x128xf32>
      %121 = arith.subf %120, %7 : vector<16x128xf32>
      %122 = vector.broadcast %114 : vector<1x128xf32> to vector<16x128xf32>
      %123 = arith.mulf %121, %122 : vector<16x128xf32>
      %124 = arith.mulf %123, %79 : vector<16x128xf32>
      %125 = arith.addf %119, %124 : vector<16x128xf32>
      %126 = vector.extract_strided_slice %8 {offsets = [18, 0], sizes = [1, 128], strides = [1, 1]} : vector<66x128xf32> to vector<1x128xf32>
      %127 = vector.extract_strided_slice %8 {offsets = [19, 0], sizes = [1, 128], strides = [1, 1]} : vector<66x128xf32> to vector<1x128xf32>
      %128 = vector.broadcast %12 : vector<1x128xf32> to vector<16x128xf32>
      %129 = arith.subf %7, %128 : vector<16x128xf32>
      %130 = vector.broadcast %126 : vector<1x128xf32> to vector<16x128xf32>
      %131 = arith.mulf %129, %130 : vector<16x128xf32>
      %132 = arith.mulf %131, %79 : vector<16x128xf32>
      %133 = vector.broadcast %14 : vector<1x128xf32> to vector<16x128xf32>
      %134 = arith.subf %133, %7 : vector<16x128xf32>
      %135 = vector.broadcast %127 : vector<1x128xf32> to vector<16x128xf32>
      %136 = arith.mulf %134, %135 : vector<16x128xf32>
      %137 = arith.mulf %136, %80 : vector<16x128xf32>
      %138 = arith.addf %132, %137 : vector<16x128xf32>
      %139 = vector.extract_strided_slice %8 {offsets = [20, 0], sizes = [1, 128], strides = [1, 1]} : vector<66x128xf32> to vector<1x128xf32>
      %140 = vector.extract_strided_slice %8 {offsets = [21, 0], sizes = [1, 128], strides = [1, 1]} : vector<66x128xf32> to vector<1x128xf32>
      %141 = vector.broadcast %13 : vector<1x128xf32> to vector<16x128xf32>
      %142 = arith.subf %7, %141 : vector<16x128xf32>
      %143 = vector.broadcast %139 : vector<1x128xf32> to vector<16x128xf32>
      %144 = arith.mulf %142, %143 : vector<16x128xf32>
      %145 = arith.mulf %144, %80 : vector<16x128xf32>
      %146 = vector.broadcast %15 : vector<1x128xf32> to vector<16x128xf32>
      %147 = arith.subf %146, %7 : vector<16x128xf32>
      %148 = vector.broadcast %140 : vector<1x128xf32> to vector<16x128xf32>
      %149 = arith.mulf %147, %148 : vector<16x128xf32>
      %150 = arith.mulf %149, %81 : vector<16x128xf32>
      %151 = arith.addf %145, %150 : vector<16x128xf32>
      %152 = vector.extract_strided_slice %8 {offsets = [22, 0], sizes = [1, 128], strides = [1, 1]} : vector<66x128xf32> to vector<1x128xf32>
      %153 = vector.extract_strided_slice %8 {offsets = [23, 0], sizes = [1, 128], strides = [1, 1]} : vector<66x128xf32> to vector<1x128xf32>
      %154 = vector.broadcast %14 : vector<1x128xf32> to vector<16x128xf32>
      %155 = arith.subf %7, %154 : vector<16x128xf32>
      %156 = vector.broadcast %152 : vector<1x128xf32> to vector<16x128xf32>
      %157 = arith.mulf %155, %156 : vector<16x128xf32>
      %158 = arith.mulf %157, %81 : vector<16x128xf32>
      %159 = vector.broadcast %16 : vector<1x128xf32> to vector<16x128xf32>
      %160 = arith.subf %159, %7 : vector<16x128xf32>
      %161 = vector.broadcast %153 : vector<1x128xf32> to vector<16x128xf32>
      %162 = arith.mulf %160, %161 : vector<16x128xf32>
      %163 = arith.mulf %162, %82 : vector<16x128xf32>
      %164 = arith.addf %158, %163 : vector<16x128xf32>
      %165 = vector.extract_strided_slice %8 {offsets = [24, 0], sizes = [1, 128], strides = [1, 1]} : vector<66x128xf32> to vector<1x128xf32>
      %166 = vector.extract_strided_slice %8 {offsets = [25, 0], sizes = [1, 128], strides = [1, 1]} : vector<66x128xf32> to vector<1x128xf32>
      %167 = vector.broadcast %15 : vector<1x128xf32> to vector<16x128xf32>
      %168 = arith.subf %7, %167 : vector<16x128xf32>
      %169 = vector.broadcast %165 : vector<1x128xf32> to vector<16x128xf32>
      %170 = arith.mulf %168, %169 : vector<16x128xf32>
      %171 = arith.mulf %170, %82 : vector<16x128xf32>
      %172 = vector.broadcast %17 : vector<1x128xf32> to vector<16x128xf32>
      %173 = arith.subf %172, %7 : vector<16x128xf32>
      %174 = vector.broadcast %166 : vector<1x128xf32> to vector<16x128xf32>
      %175 = arith.mulf %173, %174 : vector<16x128xf32>
      %176 = arith.mulf %175, %83 : vector<16x128xf32>
      %177 = arith.addf %171, %176 : vector<16x128xf32>
      %178 = vector.extract_strided_slice %8 {offsets = [26, 0], sizes = [1, 128], strides = [1, 1]} : vector<66x128xf32> to vector<1x128xf32>
      %179 = vector.extract_strided_slice %8 {offsets = [27, 0], sizes = [1, 128], strides = [1, 1]} : vector<66x128xf32> to vector<1x128xf32>
      %180 = vector.broadcast %16 : vector<1x128xf32> to vector<16x128xf32>
      %181 = arith.subf %7, %180 : vector<16x128xf32>
      %182 = vector.broadcast %178 : vector<1x128xf32> to vector<16x128xf32>
      %183 = arith.mulf %181, %182 : vector<16x128xf32>
      %184 = arith.mulf %183, %83 : vector<16x128xf32>
      %185 = vector.broadcast %18 : vector<1x128xf32> to vector<16x128xf32>
      %186 = arith.subf %185, %7 : vector<16x128xf32>
      %187 = vector.broadcast %179 : vector<1x128xf32> to vector<16x128xf32>
      %188 = arith.mulf %186, %187 : vector<16x128xf32>
      %189 = arith.mulf %188, %84 : vector<16x128xf32>
      %190 = arith.addf %184, %189 : vector<16x128xf32>
      %191 = vector.extract_strided_slice %8 {offsets = [28, 0], sizes = [1, 128], strides = [1, 1]} : vector<66x128xf32> to vector<1x128xf32>
      %192 = vector.extract_strided_slice %8 {offsets = [29, 0], sizes = [1, 128], strides = [1, 1]} : vector<66x128xf32> to vector<1x128xf32>
      %193 = vector.broadcast %17 : vector<1x128xf32> to vector<16x128xf32>
      %194 = arith.subf %7, %193 : vector<16x128xf32>
      %195 = vector.broadcast %191 : vector<1x128xf32> to vector<16x128xf32>
      %196 = arith.mulf %194, %195 : vector<16x128xf32>
      %197 = arith.mulf %196, %84 : vector<16x128xf32>
      %198 = vector.broadcast %19 : vector<1x128xf32> to vector<16x128xf32>
      %199 = arith.subf %198, %7 : vector<16x128xf32>
      %200 = vector.broadcast %192 : vector<1x128xf32> to vector<16x128xf32>
      %201 = arith.mulf %199, %200 : vector<16x128xf32>
      %202 = arith.mulf %201, %85 : vector<16x128xf32>
      %203 = arith.addf %197, %202 : vector<16x128xf32>
      %204 = vector.extract_strided_slice %8 {offsets = [30, 0], sizes = [1, 128], strides = [1, 1]} : vector<66x128xf32> to vector<1x128xf32>
      %205 = vector.extract_strided_slice %8 {offsets = [31, 0], sizes = [1, 128], strides = [1, 1]} : vector<66x128xf32> to vector<1x128xf32>
      %206 = vector.broadcast %18 : vector<1x128xf32> to vector<16x128xf32>
      %207 = arith.subf %7, %206 : vector<16x128xf32>
      %208 = vector.broadcast %204 : vector<1x128xf32> to vector<16x128xf32>
      %209 = arith.mulf %207, %208 : vector<16x128xf32>
      %210 = arith.mulf %209, %85 : vector<16x128xf32>
      %211 = vector.broadcast %20 : vector<1x128xf32> to vector<16x128xf32>
      %212 = arith.subf %211, %7 : vector<16x128xf32>
      %213 = vector.broadcast %205 : vector<1x128xf32> to vector<16x128xf32>
      %214 = arith.mulf %212, %213 : vector<16x128xf32>
      %215 = arith.mulf %214, %86 : vector<16x128xf32>
      %216 = arith.addf %210, %215 : vector<16x128xf32>
      %217 = vector.extract_strided_slice %8 {offsets = [32, 0], sizes = [1, 128], strides = [1, 1]} : vector<66x128xf32> to vector<1x128xf32>
      %218 = vector.extract_strided_slice %8 {offsets = [33, 0], sizes = [1, 128], strides = [1, 1]} : vector<66x128xf32> to vector<1x128xf32>
      %219 = vector.broadcast %9 : vector<1x128xf32> to vector<16x128xf32>
      %220 = arith.subf %7, %219 : vector<16x128xf32>
      %221 = vector.broadcast %217 : vector<1x128xf32> to vector<16x128xf32>
      %222 = arith.mulf %220, %221 : vector<16x128xf32>
      %223 = arith.mulf %222, %99 : vector<16x128xf32>
      %224 = vector.broadcast %12 : vector<1x128xf32> to vector<16x128xf32>
      %225 = arith.subf %224, %7 : vector<16x128xf32>
      %226 = vector.broadcast %218 : vector<1x128xf32> to vector<16x128xf32>
      %227 = arith.mulf %225, %226 : vector<16x128xf32>
      %228 = arith.mulf %227, %112 : vector<16x128xf32>
      %229 = arith.addf %223, %228 : vector<16x128xf32>
      %230 = vector.extract_strided_slice %8 {offsets = [34, 0], sizes = [1, 128], strides = [1, 1]} : vector<66x128xf32> to vector<1x128xf32>
      %231 = vector.extract_strided_slice %8 {offsets = [35, 0], sizes = [1, 128], strides = [1, 1]} : vector<66x128xf32> to vector<1x128xf32>
      %232 = vector.broadcast %10 : vector<1x128xf32> to vector<16x128xf32>
      %233 = arith.subf %7, %232 : vector<16x128xf32>
      %234 = vector.broadcast %230 : vector<1x128xf32> to vector<16x128xf32>
      %235 = arith.mulf %233, %234 : vector<16x128xf32>
      %236 = arith.mulf %235, %112 : vector<16x128xf32>
      %237 = vector.broadcast %13 : vector<1x128xf32> to vector<16x128xf32>
      %238 = arith.subf %237, %7 : vector<16x128xf32>
      %239 = vector.broadcast %231 : vector<1x128xf32> to vector<16x128xf32>
      %240 = arith.mulf %238, %239 : vector<16x128xf32>
      %241 = arith.mulf %240, %125 : vector<16x128xf32>
      %242 = arith.addf %236, %241 : vector<16x128xf32>
      %243 = vector.extract_strided_slice %8 {offsets = [36, 0], sizes = [1, 128], strides = [1, 1]} : vector<66x128xf32> to vector<1x128xf32>
      %244 = vector.extract_strided_slice %8 {offsets = [37, 0], sizes = [1, 128], strides = [1, 1]} : vector<66x128xf32> to vector<1x128xf32>
      %245 = vector.broadcast %11 : vector<1x128xf32> to vector<16x128xf32>
      %246 = arith.subf %7, %245 : vector<16x128xf32>
      %247 = vector.broadcast %243 : vector<1x128xf32> to vector<16x128xf32>
      %248 = arith.mulf %246, %247 : vector<16x128xf32>
      %249 = arith.mulf %248, %125 : vector<16x128xf32>
      %250 = vector.broadcast %14 : vector<1x128xf32> to vector<16x128xf32>
      %251 = arith.subf %250, %7 : vector<16x128xf32>
      %252 = vector.broadcast %244 : vector<1x128xf32> to vector<16x128xf32>
      %253 = arith.mulf %251, %252 : vector<16x128xf32>
      %254 = arith.mulf %253, %138 : vector<16x128xf32>
      %255 = arith.addf %249, %254 : vector<16x128xf32>
      %256 = vector.extract_strided_slice %8 {offsets = [38, 0], sizes = [1, 128], strides = [1, 1]} : vector<66x128xf32> to vector<1x128xf32>
      %257 = vector.extract_strided_slice %8 {offsets = [39, 0], sizes = [1, 128], strides = [1, 1]} : vector<66x128xf32> to vector<1x128xf32>
      %258 = vector.broadcast %12 : vector<1x128xf32> to vector<16x128xf32>
      %259 = arith.subf %7, %258 : vector<16x128xf32>
      %260 = vector.broadcast %256 : vector<1x128xf32> to vector<16x128xf32>
      %261 = arith.mulf %259, %260 : vector<16x128xf32>
      %262 = arith.mulf %261, %138 : vector<16x128xf32>
      %263 = vector.broadcast %15 : vector<1x128xf32> to vector<16x128xf32>
      %264 = arith.subf %263, %7 : vector<16x128xf32>
      %265 = vector.broadcast %257 : vector<1x128xf32> to vector<16x128xf32>
      %266 = arith.mulf %264, %265 : vector<16x128xf32>
      %267 = arith.mulf %266, %151 : vector<16x128xf32>
      %268 = arith.addf %262, %267 : vector<16x128xf32>
      %269 = vector.extract_strided_slice %8 {offsets = [40, 0], sizes = [1, 128], strides = [1, 1]} : vector<66x128xf32> to vector<1x128xf32>
      %270 = vector.extract_strided_slice %8 {offsets = [41, 0], sizes = [1, 128], strides = [1, 1]} : vector<66x128xf32> to vector<1x128xf32>
      %271 = vector.broadcast %13 : vector<1x128xf32> to vector<16x128xf32>
      %272 = arith.subf %7, %271 : vector<16x128xf32>
      %273 = vector.broadcast %269 : vector<1x128xf32> to vector<16x128xf32>
      %274 = arith.mulf %272, %273 : vector<16x128xf32>
      %275 = arith.mulf %274, %151 : vector<16x128xf32>
      %276 = vector.broadcast %16 : vector<1x128xf32> to vector<16x128xf32>
      %277 = arith.subf %276, %7 : vector<16x128xf32>
      %278 = vector.broadcast %270 : vector<1x128xf32> to vector<16x128xf32>
      %279 = arith.mulf %277, %278 : vector<16x128xf32>
      %280 = arith.mulf %279, %164 : vector<16x128xf32>
      %281 = arith.addf %275, %280 : vector<16x128xf32>
      %282 = vector.extract_strided_slice %8 {offsets = [42, 0], sizes = [1, 128], strides = [1, 1]} : vector<66x128xf32> to vector<1x128xf32>
      %283 = vector.extract_strided_slice %8 {offsets = [43, 0], sizes = [1, 128], strides = [1, 1]} : vector<66x128xf32> to vector<1x128xf32>
      %284 = vector.broadcast %14 : vector<1x128xf32> to vector<16x128xf32>
      %285 = arith.subf %7, %284 : vector<16x128xf32>
      %286 = vector.broadcast %282 : vector<1x128xf32> to vector<16x128xf32>
      %287 = arith.mulf %285, %286 : vector<16x128xf32>
      %288 = arith.mulf %287, %164 : vector<16x128xf32>
      %289 = vector.broadcast %17 : vector<1x128xf32> to vector<16x128xf32>
      %290 = arith.subf %289, %7 : vector<16x128xf32>
      %291 = vector.broadcast %283 : vector<1x128xf32> to vector<16x128xf32>
      %292 = arith.mulf %290, %291 : vector<16x128xf32>
      %293 = arith.mulf %292, %177 : vector<16x128xf32>
      %294 = arith.addf %288, %293 : vector<16x128xf32>
      %295 = vector.extract_strided_slice %8 {offsets = [44, 0], sizes = [1, 128], strides = [1, 1]} : vector<66x128xf32> to vector<1x128xf32>
      %296 = vector.extract_strided_slice %8 {offsets = [45, 0], sizes = [1, 128], strides = [1, 1]} : vector<66x128xf32> to vector<1x128xf32>
      %297 = vector.broadcast %15 : vector<1x128xf32> to vector<16x128xf32>
      %298 = arith.subf %7, %297 : vector<16x128xf32>
      %299 = vector.broadcast %295 : vector<1x128xf32> to vector<16x128xf32>
      %300 = arith.mulf %298, %299 : vector<16x128xf32>
      %301 = arith.mulf %300, %177 : vector<16x128xf32>
      %302 = vector.broadcast %18 : vector<1x128xf32> to vector<16x128xf32>
      %303 = arith.subf %302, %7 : vector<16x128xf32>
      %304 = vector.broadcast %296 : vector<1x128xf32> to vector<16x128xf32>
      %305 = arith.mulf %303, %304 : vector<16x128xf32>
      %306 = arith.mulf %305, %190 : vector<16x128xf32>
      %307 = arith.addf %301, %306 : vector<16x128xf32>
      %308 = vector.extract_strided_slice %8 {offsets = [46, 0], sizes = [1, 128], strides = [1, 1]} : vector<66x128xf32> to vector<1x128xf32>
      %309 = vector.extract_strided_slice %8 {offsets = [47, 0], sizes = [1, 128], strides = [1, 1]} : vector<66x128xf32> to vector<1x128xf32>
      %310 = vector.broadcast %16 : vector<1x128xf32> to vector<16x128xf32>
      %311 = arith.subf %7, %310 : vector<16x128xf32>
      %312 = vector.broadcast %308 : vector<1x128xf32> to vector<16x128xf32>
      %313 = arith.mulf %311, %312 : vector<16x128xf32>
      %314 = arith.mulf %313, %190 : vector<16x128xf32>
      %315 = vector.broadcast %19 : vector<1x128xf32> to vector<16x128xf32>
      %316 = arith.subf %315, %7 : vector<16x128xf32>
      %317 = vector.broadcast %309 : vector<1x128xf32> to vector<16x128xf32>
      %318 = arith.mulf %316, %317 : vector<16x128xf32>
      %319 = arith.mulf %318, %203 : vector<16x128xf32>
      %320 = arith.addf %314, %319 : vector<16x128xf32>
      %321 = vector.extract_strided_slice %8 {offsets = [48, 0], sizes = [1, 128], strides = [1, 1]} : vector<66x128xf32> to vector<1x128xf32>
      %322 = vector.extract_strided_slice %8 {offsets = [49, 0], sizes = [1, 128], strides = [1, 1]} : vector<66x128xf32> to vector<1x128xf32>
      %323 = vector.broadcast %17 : vector<1x128xf32> to vector<16x128xf32>
      %324 = arith.subf %7, %323 : vector<16x128xf32>
      %325 = vector.broadcast %321 : vector<1x128xf32> to vector<16x128xf32>
      %326 = arith.mulf %324, %325 : vector<16x128xf32>
      %327 = arith.mulf %326, %203 : vector<16x128xf32>
      %328 = vector.broadcast %20 : vector<1x128xf32> to vector<16x128xf32>
      %329 = arith.subf %328, %7 : vector<16x128xf32>
      %330 = vector.broadcast %322 : vector<1x128xf32> to vector<16x128xf32>
      %331 = arith.mulf %329, %330 : vector<16x128xf32>
      %332 = arith.mulf %331, %216 : vector<16x128xf32>
      %333 = arith.addf %327, %332 : vector<16x128xf32>
      %334 = vector.extract_strided_slice %8 {offsets = [50, 0], sizes = [1, 128], strides = [1, 1]} : vector<66x128xf32> to vector<1x128xf32>
      %335 = vector.extract_strided_slice %8 {offsets = [51, 0], sizes = [1, 128], strides = [1, 1]} : vector<66x128xf32> to vector<1x128xf32>
      %336 = vector.broadcast %9 : vector<1x128xf32> to vector<16x128xf32>
      %337 = arith.subf %7, %336 : vector<16x128xf32>
      %338 = vector.broadcast %334 : vector<1x128xf32> to vector<16x128xf32>
      %339 = arith.mulf %337, %338 : vector<16x128xf32>
      %340 = arith.mulf %339, %229 : vector<16x128xf32>
      %341 = vector.broadcast %13 : vector<1x128xf32> to vector<16x128xf32>
      %342 = arith.subf %341, %7 : vector<16x128xf32>
      %343 = vector.broadcast %335 : vector<1x128xf32> to vector<16x128xf32>
      %344 = arith.mulf %342, %343 : vector<16x128xf32>
      %345 = arith.mulf %344, %242 : vector<16x128xf32>
      %346 = arith.addf %340, %345 : vector<16x128xf32>
      %347 = vector.extract_strided_slice %8 {offsets = [52, 0], sizes = [1, 128], strides = [1, 1]} : vector<66x128xf32> to vector<1x128xf32>
      %348 = vector.extract_strided_slice %8 {offsets = [53, 0], sizes = [1, 128], strides = [1, 1]} : vector<66x128xf32> to vector<1x128xf32>
      %349 = vector.broadcast %10 : vector<1x128xf32> to vector<16x128xf32>
      %350 = arith.subf %7, %349 : vector<16x128xf32>
      %351 = vector.broadcast %347 : vector<1x128xf32> to vector<16x128xf32>
      %352 = arith.mulf %350, %351 : vector<16x128xf32>
      %353 = arith.mulf %352, %242 : vector<16x128xf32>
      %354 = vector.broadcast %14 : vector<1x128xf32> to vector<16x128xf32>
      %355 = arith.subf %354, %7 : vector<16x128xf32>
      %356 = vector.broadcast %348 : vector<1x128xf32> to vector<16x128xf32>
      %357 = arith.mulf %355, %356 : vector<16x128xf32>
      %358 = arith.mulf %357, %255 : vector<16x128xf32>
      %359 = arith.addf %353, %358 : vector<16x128xf32>
      %360 = vector.extract_strided_slice %8 {offsets = [54, 0], sizes = [1, 128], strides = [1, 1]} : vector<66x128xf32> to vector<1x128xf32>
      %361 = vector.extract_strided_slice %8 {offsets = [55, 0], sizes = [1, 128], strides = [1, 1]} : vector<66x128xf32> to vector<1x128xf32>
      %362 = vector.broadcast %11 : vector<1x128xf32> to vector<16x128xf32>
      %363 = arith.subf %7, %362 : vector<16x128xf32>
      %364 = vector.broadcast %360 : vector<1x128xf32> to vector<16x128xf32>
      %365 = arith.mulf %363, %364 : vector<16x128xf32>
      %366 = arith.mulf %365, %255 : vector<16x128xf32>
      %367 = vector.broadcast %15 : vector<1x128xf32> to vector<16x128xf32>
      %368 = arith.subf %367, %7 : vector<16x128xf32>
      %369 = vector.broadcast %361 : vector<1x128xf32> to vector<16x128xf32>
      %370 = arith.mulf %368, %369 : vector<16x128xf32>
      %371 = arith.mulf %370, %268 : vector<16x128xf32>
      %372 = arith.addf %366, %371 : vector<16x128xf32>
      %373 = vector.extract_strided_slice %8 {offsets = [56, 0], sizes = [1, 128], strides = [1, 1]} : vector<66x128xf32> to vector<1x128xf32>
      %374 = vector.extract_strided_slice %8 {offsets = [57, 0], sizes = [1, 128], strides = [1, 1]} : vector<66x128xf32> to vector<1x128xf32>
      %375 = vector.broadcast %12 : vector<1x128xf32> to vector<16x128xf32>
      %376 = arith.subf %7, %375 : vector<16x128xf32>
      %377 = vector.broadcast %373 : vector<1x128xf32> to vector<16x128xf32>
      %378 = arith.mulf %376, %377 : vector<16x128xf32>
      %379 = arith.mulf %378, %268 : vector<16x128xf32>
      %380 = vector.broadcast %16 : vector<1x128xf32> to vector<16x128xf32>
      %381 = arith.subf %380, %7 : vector<16x128xf32>
      %382 = vector.broadcast %374 : vector<1x128xf32> to vector<16x128xf32>
      %383 = arith.mulf %381, %382 : vector<16x128xf32>
      %384 = arith.mulf %383, %281 : vector<16x128xf32>
      %385 = arith.addf %379, %384 : vector<16x128xf32>
      %386 = vector.extract_strided_slice %8 {offsets = [58, 0], sizes = [1, 128], strides = [1, 1]} : vector<66x128xf32> to vector<1x128xf32>
      %387 = vector.extract_strided_slice %8 {offsets = [59, 0], sizes = [1, 128], strides = [1, 1]} : vector<66x128xf32> to vector<1x128xf32>
      %388 = vector.broadcast %13 : vector<1x128xf32> to vector<16x128xf32>
      %389 = arith.subf %7, %388 : vector<16x128xf32>
      %390 = vector.broadcast %386 : vector<1x128xf32> to vector<16x128xf32>
      %391 = arith.mulf %389, %390 : vector<16x128xf32>
      %392 = arith.mulf %391, %281 : vector<16x128xf32>
      %393 = vector.broadcast %17 : vector<1x128xf32> to vector<16x128xf32>
      %394 = arith.subf %393, %7 : vector<16x128xf32>
      %395 = vector.broadcast %387 : vector<1x128xf32> to vector<16x128xf32>
      %396 = arith.mulf %394, %395 : vector<16x128xf32>
      %397 = arith.mulf %396, %294 : vector<16x128xf32>
      %398 = arith.addf %392, %397 : vector<16x128xf32>
      %399 = vector.extract_strided_slice %8 {offsets = [60, 0], sizes = [1, 128], strides = [1, 1]} : vector<66x128xf32> to vector<1x128xf32>
      %400 = vector.extract_strided_slice %8 {offsets = [61, 0], sizes = [1, 128], strides = [1, 1]} : vector<66x128xf32> to vector<1x128xf32>
      %401 = vector.broadcast %14 : vector<1x128xf32> to vector<16x128xf32>
      %402 = arith.subf %7, %401 : vector<16x128xf32>
      %403 = vector.broadcast %399 : vector<1x128xf32> to vector<16x128xf32>
      %404 = arith.mulf %402, %403 : vector<16x128xf32>
      %405 = arith.mulf %404, %294 : vector<16x128xf32>
      %406 = vector.broadcast %18 : vector<1x128xf32> to vector<16x128xf32>
      %407 = arith.subf %406, %7 : vector<16x128xf32>
      %408 = vector.broadcast %400 : vector<1x128xf32> to vector<16x128xf32>
      %409 = arith.mulf %407, %408 : vector<16x128xf32>
      %410 = arith.mulf %409, %307 : vector<16x128xf32>
      %411 = arith.addf %405, %410 : vector<16x128xf32>
      %412 = vector.extract_strided_slice %8 {offsets = [62, 0], sizes = [1, 128], strides = [1, 1]} : vector<66x128xf32> to vector<1x128xf32>
      %413 = vector.extract_strided_slice %8 {offsets = [63, 0], sizes = [1, 128], strides = [1, 1]} : vector<66x128xf32> to vector<1x128xf32>
      %414 = vector.broadcast %15 : vector<1x128xf32> to vector<16x128xf32>
      %415 = arith.subf %7, %414 : vector<16x128xf32>
      %416 = vector.broadcast %412 : vector<1x128xf32> to vector<16x128xf32>
      %417 = arith.mulf %415, %416 : vector<16x128xf32>
      %418 = arith.mulf %417, %307 : vector<16x128xf32>
      %419 = vector.broadcast %19 : vector<1x128xf32> to vector<16x128xf32>
      %420 = arith.subf %419, %7 : vector<16x128xf32>
      %421 = vector.broadcast %413 : vector<1x128xf32> to vector<16x128xf32>
      %422 = arith.mulf %420, %421 : vector<16x128xf32>
      %423 = arith.mulf %422, %320 : vector<16x128xf32>
      %424 = arith.addf %418, %423 : vector<16x128xf32>
      %425 = vector.extract_strided_slice %8 {offsets = [64, 0], sizes = [1, 128], strides = [1, 1]} : vector<66x128xf32> to vector<1x128xf32>
      %426 = vector.extract_strided_slice %8 {offsets = [65, 0], sizes = [1, 128], strides = [1, 1]} : vector<66x128xf32> to vector<1x128xf32>
      %427 = vector.broadcast %16 : vector<1x128xf32> to vector<16x128xf32>
      %428 = arith.subf %7, %427 : vector<16x128xf32>
      %429 = vector.broadcast %425 : vector<1x128xf32> to vector<16x128xf32>
      %430 = arith.mulf %428, %429 : vector<16x128xf32>
      %431 = arith.mulf %430, %320 : vector<16x128xf32>
      %432 = vector.broadcast %20 : vector<1x128xf32> to vector<16x128xf32>
      %433 = arith.subf %432, %7 : vector<16x128xf32>
      %434 = vector.broadcast %426 : vector<1x128xf32> to vector<16x128xf32>
      %435 = arith.mulf %433, %434 : vector<16x128xf32>
      %436 = arith.mulf %435, %333 : vector<16x128xf32>
      %437 = arith.addf %431, %436 : vector<16x128xf32>
      %c0_13 = arith.constant 0 : index
      %c128 = arith.constant 128 : index
      %438 = vector.load %arg6[%c0_13, %c128] : memref<16x1152xf32, #tpu.memory_space<vmem>>, vector<16x128xf32>
      tpu.vector_store %arg6[%c0_13, %c128], %346 {strides = array<i32>} : memref<16x1152xf32, #tpu.memory_space<vmem>>, vector<16x128xf32>,
      %c0_14 = arith.constant 0 : index
      %c256 = arith.constant 256 : index
      %439 = vector.load %arg6[%c0_14, %c256] : memref<16x1152xf32, #tpu.memory_space<vmem>>, vector<16x128xf32>
      tpu.vector_store %arg6[%c0_14, %c256], %359 {strides = array<i32>} : memref<16x1152xf32, #tpu.memory_space<vmem>>, vector<16x128xf32>,
      %c0_15 = arith.constant 0 : index
      %c384 = arith.constant 384 : index
      %440 = vector.load %arg6[%c0_15, %c384] : memref<16x1152xf32, #tpu.memory_space<vmem>>, vector<16x128xf32>
      tpu.vector_store %arg6[%c0_15, %c384], %372 {strides = array<i32>} : memref<16x1152xf32, #tpu.memory_space<vmem>>, vector<16x128xf32>,
      %c0_16 = arith.constant 0 : index
      %c512 = arith.constant 512 : index
      %441 = vector.load %arg6[%c0_16, %c512] : memref<16x1152xf32, #tpu.memory_space<vmem>>, vector<16x128xf32>
      tpu.vector_store %arg6[%c0_16, %c512], %385 {strides = array<i32>} : memref<16x1152xf32, #tpu.memory_space<vmem>>, vector<16x128xf32>,
      %c0_17 = arith.constant 0 : index
      %c640 = arith.constant 640 : index
      %442 = vector.load %arg6[%c0_17, %c640] : memref<16x1152xf32, #tpu.memory_space<vmem>>, vector<16x128xf32>
      tpu.vector_store %arg6[%c0_17, %c640], %398 {strides = array<i32>} : memref<16x1152xf32, #tpu.memory_space<vmem>>, vector<16x128xf32>,
      %c0_18 = arith.constant 0 : index
      %c768 = arith.constant 768 : index
      %443 = vector.load %arg6[%c0_18, %c768] : memref<16x1152xf32, #tpu.memory_space<vmem>>, vector<16x128xf32>
      tpu.vector_store %arg6[%c0_18, %c768], %411 {strides = array<i32>} : memref<16x1152xf32, #tpu.memory_space<vmem>>, vector<16x128xf32>,
      %c0_19 = arith.constant 0 : index
      %c896 = arith.constant 896 : index
      %444 = vector.load %arg6[%c0_19, %c896] : memref<16x1152xf32, #tpu.memory_space<vmem>>, vector<16x128xf32>
      tpu.vector_store %arg6[%c0_19, %c896], %424 {strides = array<i32>} : memref<16x1152xf32, #tpu.memory_space<vmem>>, vector<16x128xf32>,
      %c0_20 = arith.constant 0 : index
      %c1024 = arith.constant 1024 : index
      %445 = vector.load %arg6[%c0_20, %c1024] : memref<16x1152xf32, #tpu.memory_space<vmem>>, vector<16x128xf32>
      tpu.vector_store %arg6[%c0_20, %c1024], %437 {strides = array<i32>} : memref<16x1152xf32, #tpu.memory_space<vmem>>, vector<16x128xf32>,
    } else {
    }
    %c0 = arith.constant 0 : index
    %c0_1 = arith.constant 0 : index
    %3 = vector.load %arg6[%c0, %c0_1] : memref<16x1152xf32, #tpu.memory_space<vmem>>, vector<16x1152xf32>
    %c0_2 = arith.constant 0 : index
    %c0_3 = arith.constant 0 : index
    %4 = vector.load %arg4[%c0_2, %c0_3] : memref<1152x128xf32, #tpu.memory_space<vmem>>, vector<1152x128xf32>
    %cst = arith.constant dense<0.000000e+00> : vector<16x128xf32>
    %5 = tpu.matmul %3, %4, %cst {dimension_numbers = #tpu.dot_dimension_numbers<[1], [0], [0], [1], [0, 0, 1, 1], [], []>} : vector<16x1152xf32>, vector<1152x128xf32>, vector<16x128xf32> -> vector<16x128xf32>
    %c0_4 = arith.constant 0 : index
    %c0_5 = arith.constant 0 : index
    %6 = vector.load %arg5[%c0_4, %c0_5] : memref<16x128xf32, #tpu.memory_space<vmem>>, vector<16x128xf32>
    tpu.vector_store %arg5[%c0_4, %c0_5], %5 {strides = array<i32>} : memref<16x128xf32, #tpu.memory_space<vmem>>, vector<16x128xf32>,
    return
  }
  func.func @transform_0(%arg0: i32, %arg1: i32) -> (i32, i32) {
    %c0_i32 = arith.constant 0 : i32
    %c0_i32_0 = arith.constant 0 : i32
    return %arg0, %c0_i32 : i32, i32
  }
  func.func @transform_1(%arg0: i32, %arg1: i32) -> (i32, i32) {
    %c0_i32 = arith.constant 0 : i32
    %c0_i32_0 = arith.constant 0 : i32
    %c0_i32_1 = arith.constant 0 : i32
    return %c0_i32, %c0_i32_0 : i32, i32
  }
  func.func @transform_2(%arg0: i32, %arg1: i32) -> (i32, i32) {
    %c0_i32 = arith.constant 0 : i32
    %c0_i32_0 = arith.constant 0 : i32
    return %c0_i32, %arg1 : i32, i32
  }
  func.func @transform_3(%arg0: i32, %arg1: i32) -> (i32, i32) {
    %c0_i32 = arith.constant 0 : i32
    return %arg0, %arg1 : i32, i32
  }
}

</mosaic_0001>

<bundles_post_ra>
// kernel: tpu_custom_call.1
= control target key start
LH: loop header
LB: loop body
LE: loop exit
PB: predicated region body
PF: predicated region fallthrough
CT: control target
= control target key end

     0   :  { %8 = vsyncpa [#allocation4], 0  ;;  %s2457_s0 = inlined_call_operand.hbm [shape: f32[16,128], index: 0, kind: input, shape index: {}]   ;;  %s2458_s1 = inlined_call_operand.hbm [shape: f32[66,128], index: 1, kind: input, shape index: {}]   ;;  %s2459_s2 = inlined_call_operand.hbm [shape: f32[1152,128], index: 2, kind: input, shape index: {}]   ;;  %s2460_s3 = inlined_call_operand.hbm [shape: f32[16,128], index: 3, kind: output, shape index: {}]  }
   0x1   :  { %9 = vsyncpa [#allocation7], 0 }
   0x2   :  { %10 = vsyncpa [#allocation5], 0  ;;  %s1663_s12 = smov [#allocation6]   ;;  %s1664_s14 = smov [#allocation3]  }
   0x3   :  { %s28_s13 = sshll.u32 %s1663_s12, 4  ;;  %s16_s15 = sshll.u32 %s1664_s14, 4  ;;  %s29_s13 = int_to_ptr.vmem [resolvable:$true] %s28_s13  ;;  %s17_s15 = int_to_ptr.vmem [resolvable:$true] %s16_s15 }
   0x4   :  { %s1585_s16 = scalar_lea.vmem %s29_s13, 1152  ;;  %p1590_p1 = scmp.lt.s32.totalorder %s29_s13, %s29_s13 }
   0x5   :  { %p1586_p0 = scmp.ne.s32.totalorder %s29_s13, %s1585_s16  ;;  %p1591_p2 = scmp.lt.s32.totalorder %s1585_s16, %s1585_s16 }
   0x7   :  { %p1592_p3 = por %p1591_p2, %p1590_p1 }
   0x9   :  { %p1593_p4 = pnand %p1592_p3, %p1586_p0 }
   0xb   :  { %1596 = shalt.err (!%p1593_p4)
}
   0xc   :  { %s1665_s17 = smov 128   ;;  %s1666_s18 = smov 8  }
   0xd   :  { %34 = dma.hbm_to_vmem [thread:$0]  %s2458_s1, 1152, %s29_s13, [#allocation7], %s1665_s17, %s1665_s17, %s1666_s18  }
   0xe   :  { %s1605_s21 = scalar_lea.vmem %s17_s15, 256  ;;  %p1610_p6 = scmp.lt.s32.totalorder %s17_s15, %s17_s15 }
   0xf   :  { %p1606_p5 = scmp.ne.s32.totalorder %s17_s15, %s1605_s21  ;;  %p1611_p7 = scmp.lt.s32.totalorder %s1605_s21, %s1605_s21 }
  0x11   :  { %p1612_p8 = por %p1611_p7, %p1610_p6 }
  0x13   :  { %p1613_p9 = pnand %p1612_p8, %p1606_p5 }
  0x15   :  { %1616 = shalt.err (!%p1613_p9)
}
  0x16   :  { %22 = dma.hbm_to_vmem [thread:$0]  %s2457_s0, 256, %s17_s15, [#allocation4], %s1665_s17, %s1665_s17, %s1666_s18  }
  0x17   :  { %s1667_s24 = smov [#allocation8]  }
  0x18   :  { %s40_s25 = sshll.u32 %s1667_s24, 4  ;;  %s41_s25 = int_to_ptr.vmem [resolvable:$true] %s40_s25 }
  0x19   :  { %s1625_s26 = scalar_lea.vmem %s41_s25, 18432  ;;  %p1630_p11 = scmp.lt.s32.totalorder %s41_s25, %s41_s25 }
  0x1a   :  { %p1626_p10 = scmp.ne.s32.totalorder %s41_s25, %s1625_s26  ;;  %p1631_p12 = scmp.lt.s32.totalorder %s1625_s26, %s1625_s26 }
  0x1c   :  { %p1632_p13 = por %p1631_p12, %p1630_p11 }
  0x1e   :  { %p1633_p0 = pnand %p1632_p13, %p1626_p10 }
  0x20   :  { %1636 = shalt.err (!%p1633_p0)
}
  0x21   :  { %46 = dma.hbm_to_vmem [thread:$0]  %s2459_s2, 18432, %s41_s25, [#allocation7], %s1665_s17, %s1665_s17, %s1666_s18  }
  0x22   :  { %1657 = dma.done.wait [#allocation4], 256  }
  0x23   :  { %1658 = vsyncadd [#allocation4], 4294967040 }
  0x24   :  { %1659 = dma.done.wait [#allocation7], 19584  }
  0x25   :  { %1660 = vsyncadd [#allocation7], 4294947712  ;;  %v820_v0 = vld [vmem:[#allocation8 + $0xf8] sm:$0xff]  ;;  %v819_v3 = vld [vmem:[#allocation8 + $0xf0] sm:$0xff]  ;;  %v87_v26 = vlaneseq  ;;  %s1669_s0 = smov [#allocation9]  }
  0x26   :  { %v804_v1 = vld [vmem:[#allocation8 + $0x78] sm:$0xff]  ;;  %1354 = vmatprep.subr.mxu0 %v820_v0  ;;  %v803_v5 = vld [vmem:[#allocation8 + $0x70] sm:$0xff]  ;;  %v818_v7 = vld [vmem:[#allocation8 + $0xe8] sm:$0xff]  ;;  %s1315_s2 = sshll.u32 %s1669_s0, 4  ;;  %s1316_s2 = int_to_ptr.vmem [resolvable:$true] %s1315_s2 }
  0x27   :  { %v852_v2 = vld [vmem:[#allocation8 + $0x1f8] sm:$0xff]  ;;  %1355 = vmatpush3.msra.mxu0 %v804_v1  ;;  %v851_v6 = vld [vmem:[#allocation8 + $0x1f0] sm:$0xff]  ;;  %v802_v9 = vld [vmem:[#allocation8 + $0x68] sm:$0xff]  ;;  %v88_v35 = vshrl.u32 %v87_v26, 7  ;;  %s1637_s28 = scalar_lea.vmem %s1316_s2, 256  ;;  %p1642_p2 = scmp.lt.s32.totalorder %s1316_s2, %s1316_s2 }
  0x28   :  { %1392 = vmatprep.subr.mxu1 %v852_v2  ;;  %v836_v4 = vld [vmem:[#allocation8 + $0x178] sm:$0xff]  ;;  %v835_v8 = vld [vmem:[#allocation8 + $0x170] sm:$0xff]  ;;  %1356 = vmatprep.subr.mxu0 %v819_v3  ;;  %v850_v10 = vld [vmem:[#allocation8 + $0x1e8] sm:$0xff]  ;;  %p1638_p1 = scmp.ne.s32.totalorder %s1316_s2, %s1637_s28  ;;  %p1643_p3 = scmp.lt.s32.totalorder %s1637_s28, %s1637_s28 }
  0x29   :  { %1393 = vmatpush3.msra.mxu1 %v836_v4  ;;  %1357 = vmatpush3.msra.mxu0 %v803_v5  ;;  %v817_v11 = vld [vmem:[#allocation8 + $0xe0] sm:$0xff]  ;;  %v834_v12 = vld [vmem:[#allocation8 + $0x168] sm:$0xff]  ;;  %v816_v16 = vld [vmem:[#allocation8 + $0xd8] sm:$0xff]  ;;  %v1708_v44 = vsub.s32 0, %v88_v35  ;;  %v1710_v45 = vsub.s32 1, %v88_v35  ;;  %v1712_v46 = vsub.s32 2, %v88_v35 }
  0x2a   :  { %1394 = vmatprep.subr.mxu1 %v851_v6  ;;  %v849_v13 = vld [vmem:[#allocation8 + $0x1e0] sm:$0xff]  ;;  %1358 = vmatprep.subr.mxu0 %v818_v7  ;;  %v848_v17 = vld [vmem:[#allocation8 + $0x1d8] sm:$0xff]  ;;  %v815_v20 = vld [vmem:[#allocation8 + $0xd0] sm:$0xff]  ;;  %v1714_v50 = vsub.s32 3, %v88_v35  ;;  %v1716_v51 = vsub.s32 4, %v88_v35  ;;  %v1724_v58 = vsub.s32 5, %v88_v35  ;;  %p1644_p4 = por %p1643_p3, %p1642_p2 }
  0x2b   :  { %1395 = vmatpush3.msra.mxu1 %v835_v8  ;;  %v801_v14 = vld [vmem:[#allocation8 + $0x60] sm:$0xff]  ;;  %1359 = vmatpush3.msra.mxu0 %v802_v9  ;;  %v800_v18 = vld [vmem:[#allocation8 + $0x58] sm:$0xff]  ;;  %v847_v21 = vld [vmem:[#allocation8 + $0x1d0] sm:$0xff]  ;;  %2496 = vst [vmem:[#allocation13_spill] sm:$0xff] %v1710_v45  ;;  %v1738_v0 = vsub.s32 6, %v88_v35  ;;  %v1748_v5 = vsub.s32 7, %v88_v35 }
  0x2c   :  { %1396 = vmatprep.subr.mxu1 %v850_v10  ;;  %v833_v15 = vld [vmem:[#allocation8 + $0x160] sm:$0xff]  ;;  %1360 = vmatprep.subr.mxu0 %v817_v11  ;;  %v832_v19 = vld [vmem:[#allocation8 + $0x158] sm:$0xff]  ;;  %v799_v22 = vld [vmem:[#allocation8 + $0x50] sm:$0xff]  ;;  %2497 = vst [vmem:[#allocation14_spill] sm:$0xff] %v1712_v46  ;;  %p1645_p5 = pnand %p1644_p4, %p1638_p1 }
  0x2d   :  { %1397 = vmatpush3.msra.mxu1 %v834_v12  ;;  %1361 = vmatpush3.msra.mxu0 %v801_v14  ;;  %v831_v23 = vld [vmem:[#allocation8 + $0x150] sm:$0xff]  ;;  %v814_v24 = vld [vmem:[#allocation8 + $0xc8] sm:$0xff]  ;;  %v813_v29 = vld [vmem:[#allocation8 + $0xc0] sm:$0xff]  ;;  %2498 = vst [vmem:[#allocation15_spill] sm:$0xff] %v1714_v50  ;;  %v2461_v12 = vmov 0.0  }
  0x2e   :  { %1398 = vmatprep.subr.mxu1 %v849_v13  ;;  %1362 = vmatprep.subr.mxu0 %v816_v16  ;;  %v846_v25 = vld [vmem:[#allocation8 + $0x1c8] sm:$0xff]  ;;  %v845_v30 = vld [vmem:[#allocation8 + $0x1c0] sm:$0xff]  ;;  %v812_v33 = vld [vmem:[#allocation8 + $0xb8] sm:$0xff]  ;;  %2500 = vst [vmem:[#allocation17_spill] sm:$0xff] %v1724_v58 }
  0x2f   :  { %1399 = vmatpush3.msra.mxu1 %v833_v15  ;;  %1363 = vmatpush3.msra.mxu0 %v800_v18  ;;  %v798_v27 = vld [vmem:[#allocation8 + $0x48] sm:$0xff]  ;;  %v797_v31 = vld [vmem:[#allocation8 + $0x40] sm:$0xff]  ;;  %v844_v34 = vld [vmem:[#allocation8 + $0x1b8] sm:$0xff]  ;;  %2501 = vst [vmem:[#allocation18_spill] sm:$0xff] %v1738_v0 }
  0x30   :  { %1400 = vmatprep.subr.mxu1 %v848_v17  ;;  %1364 = vmatprep.subr.mxu0 %v815_v20  ;;  %v830_v28 = vld [vmem:[#allocation8 + $0x148] sm:$0xff]  ;;  %v829_v32 = vld [vmem:[#allocation8 + $0x140] sm:$0xff]  ;;  %v796_v36 = vld [vmem:[#allocation8 + $0x38] sm:$0xff]  ;;  %2502 = vst [vmem:[#allocation19_spill] sm:$0xff] %v1748_v5 }
  0x31   :  { %1401 = vmatpush3.msra.mxu1 %v832_v19  ;;  %1365 = vmatpush3.msra.mxu0 %v799_v22  ;;  %v828_v37 = vld [vmem:[#allocation8 + $0x138] sm:$0xff]  ;;  %v811_v38 = vld [vmem:[#allocation8 + $0xb0] sm:$0xff]  ;;  %v810_v42 = vld [vmem:[#allocation8 + $0xa8] sm:$0xff] }
  0x32   :  { %1402 = vmatprep.subr.mxu1 %v847_v21  ;;  %1366 = vmatprep.subr.mxu0 %v814_v24  ;;  %v843_v39 = vld [vmem:[#allocation8 + $0x1b0] sm:$0xff]  ;;  %v842_v43 = vld [vmem:[#allocation8 + $0x1a8] sm:$0xff]  ;;  %v809_v48 = vld [vmem:[#allocation8 + $0xa0] sm:$0xff] }
  0x33   :  { %1403 = vmatpush3.msra.mxu1 %v831_v23  ;;  %1367 = vmatpush3.msra.mxu0 %v798_v27  ;;  %v795_v40 = vld [vmem:[#allocation8 + $0x30] sm:$0xff]  ;;  %v794_v47 = vld [vmem:[#allocation8 + $0x28] sm:$0xff]  ;;  %v793_v52 = vld [vmem:[#allocation8 + $0x20] sm:$0xff] }
  0x34   :  { %1404 = vmatprep.subr.mxu1 %v846_v25  ;;  %1368 = vmatprep.subr.mxu0 %v813_v29  ;;  %v827_v41 = vld [vmem:[#allocation8 + $0x130] sm:$0xff]  ;;  %v826_v49 = vld [vmem:[#allocation8 + $0x128] sm:$0xff]  ;;  %v841_v53 = vld [vmem:[#allocation8 + $0x1a0] sm:$0xff] }
  0x35   :  { %1405 = vmatpush3.msra.mxu1 %v830_v28  ;;  %1369 = vmatpush3.msra.mxu0 %v797_v31  ;;  %v825_v54 = vld [vmem:[#allocation8 + $0x120] sm:$0xff]  ;;  %v1718_v55 = vld [vmem:[#allocation3] sm:$0xff]  ;;  %v1720_v56 = vld [vmem:[#allocation6] sm:$0xff] }
  0x36   :  { %1406 = vmatprep.subr.mxu1 %v845_v30  ;;  %1370 = vmatprep.subr.mxu0 %v812_v33  ;;  %v1722_v57 = vld [vmem:[#allocation6 + $0x8] sm:$0xff]  ;;  %v808_v59 = vld [vmem:[#allocation8 + $0x98] sm:$0xff]  ;;  %v1728_v61 = vrot.slane %v1720_v56, %v1708_v44  ;;  %v1732_v62 = vrot.slane %v1720_v56, %v1710_v45  ;;  %v1736_v63 = vrot.slane %v1720_v56, %v1712_v46  ;;  %v807_v7 = vld [vmem:[#allocation8 + $0x90] sm:$0xff]  ;;  %v1328_v9 = vmul.f32 -1.442695, %v1718_v55 }
  0x37   :  { %1407 = vmatpush3.msra.mxu1 %v829_v32  ;;  %1371 = vmatpush3.msra.mxu0 %v796_v36  ;;  %2499 = vst [vmem:[#allocation16_spill] sm:$0xff] %v1722_v57  ;;  %v840_v60 = vld [vmem:[#allocation8 + $0x198] sm:$0xff]  ;;  %v1742_v3 = vrot.slane %v1720_v56, %v1714_v50  ;;  %v1746_v4 = vrot.slane %v1720_v56, %v1716_v51  ;;  %v839_v8 = vld [vmem:[#allocation8 + $0x190] sm:$0xff]  ;;  %v806_v16 = vld [vmem:[#allocation8 + $0x88] sm:$0xff] }
  0x38   :  { %1408 = vmatprep.subr.mxu1 %v844_v34  ;;  %1372 = vmatprep.subr.mxu0 %v811_v38  ;;  %v792_v1 = vld [vmem:[#allocation8 + $0x18] sm:$0xff]  ;;  %v1752_v6 = vrot.slane %v1722_v57, %v1716_v51  ;;  %vm91_vm0 = vcmp.ge.f32.partialorder %v1718_v55, %v1728_v61  ;;  %vm101_vm1 = vcmp.ge.f32.partialorder %v1718_v55, %v1732_v62  ;;  %v791_v10 = vld [vmem:[#allocation8 + $0x10] sm:$0xff]  ;;  %v838_v17 = vld [vmem:[#allocation8 + $0x188] sm:$0xff]  ;;  %1566 = vpow2.f32 %v1328_v9 }
  0x39   :  { %1409 = vmatpush3.msra.mxu1 %v828_v37  ;;  %1373 = vmatpush3.msra.mxu0 %v795_v40  ;;  %v824_v2 = vld [vmem:[#allocation8 + $0x118] sm:$0xff]  ;;  %vm111_vm2 = vcmp.ge.f32.partialorder %v1718_v55, %v1736_v63  ;;  %v823_v11 = vld [vmem:[#allocation8 + $0x110] sm:$0xff]  ;;  %v1330_v13 = vsel %vm91_vm0, 1.0, %v2461_v12  ;;  %v1332_v14 = vsel %vm101_vm1, 1.0, %v2461_v12  ;;  %vm121_vm3 = vcmp.ge.f32.partialorder %v1718_v55, %v1742_v3  ;;  %v790_v21 = vld [vmem:[#allocation8 + $0x8] sm:$0xff] }
  0x3a   :  { %1410 = vmatprep.subr.mxu1 %v843_v39  ;;  %1374 = vmatprep.subr.mxu0 %v810_v42  ;;  %v1334_v15 = vsel %vm111_vm2, 1.0, %v2461_v12  ;;  %v1336_v18 = vsel %vm121_vm3, 1.0, %v2461_v12  ;;  %vm131_vm4 = vcmp.ge.f32.partialorder %v1718_v55, %v1746_v4  ;;  %v207_v19 = vsub.f32 %v1330_v13, %v1332_v14  ;;  %v822_v22 = vld [vmem:[#allocation8 + $0x108] sm:$0xff]  ;;  %v805_v27 = vld [vmem:[#allocation8 + $0x80] sm:$0xff]  ;;  %v1799_v37 = vld [vmem:[#allocation6 + $0x20] sm:$0xff] }
  0x3b   :  { %1411 = vmatpush3.msra.mxu1 %v827_v41  ;;  %1375 = vmatpush3.msra.mxu0 %v794_v47  ;;  %v209_v20 = vsub.f32 %v1332_v14, %v1334_v15  ;;  %v1770_v23 = vsel %vm131_vm4, 1.0, %v2461_v12  ;;  %v211_v24 = vsub.f32 %v1334_v15, %v1336_v18  ;;  %v1774_v25 = vsub.f32 %v1718_v55, %v1728_v61  ;;  %v837_v28 = vld [vmem:[#allocation8 + $0x180] sm:$0xff]  ;;  %v1778_v29 = vld [vmem:[#allocation6 + $0x10] sm:$0xff] }
  0x3c   :  { %1412 = vmatprep.subr.mxu1 %v842_v43  ;;  %1376 = vmatprep.subr.mxu0 %v809_v48  ;;  %v239_v26 = vsub.f32 %v1736_v63, %v1718_v55  ;;  %v1781_v30 = vsub.f32 %v1336_v18, %v1770_v23  ;;  %v1785_v31 = vrot.slane %v1722_v57, %v1724_v58  ;;  %v789_v33 = vld [vmem:[#allocation8] sm:$0xff]  ;;  %v884_v48 = vld [vmem:[#allocation8 + $0x2f8] sm:$0xff] }
  0x3d   :  { %1413 = vmatpush3.msra.mxu1 %v826_v49  ;;  %1377 = vmatpush3.msra.mxu0 %v793_v52  ;;  %v1789_v32 = vsub.f32 %v1718_v55, %v1732_v62  ;;  %v235_v34 = vmul.f32 %v1752_v6, %v1774_v25  ;;  %v1795_v35 = vrot.slane %v1722_v57, %v1738_v0  ;;  %v821_v41 = vld [vmem:[#allocation8 + $0x100] sm:$0xff] }
  0x3e   :  { %1414 = vmatprep.subr.mxu1 %v841_v53  ;;  %1378 = vmatprep.subr.mxu0 %v808_v59  ;;  %v261_v36 = vsub.f32 %v1742_v3, %v1718_v55  ;;  %v245_v38 = vmul.f32 %v1785_v31, %v239_v26  ;;  %v1804_v39 = vrot.slane %v1722_v57, %v1748_v5  ;;  %v916_v59 = vld [vmem:[#allocation8 + $0x3f8] sm:$0xff]  ;;  %v1972_v57 = vld [vmem:[#allocation6 + $0x38] sm:$0xff] }
  0x3f   :  { %1415 = vmatpush3.msra.mxu1 %v825_v54  ;;  %1379 = vmatpush3.msra.mxu0 %v792_v1  ;;  %v1808_v40 = vsub.f32 %v1718_v55, %v1736_v63  ;;  %v237_v42 = vmul.f32 %v235_v34, %v207_v19  ;;  %v257_v43 = vmul.f32 %v1795_v35, %v1789_v32 }
  0x40   :  { %1416 = vmatprep.subr.mxu1 %v840_v60  ;;  %1380 = vmatprep.subr.mxu0 %v807_v7  ;;  %v1814_v47 = vrot.slane %v1778_v29, %v1708_v44  ;;  %v247_v49 = vmul.f32 %v245_v38, %v209_v20  ;;  %v267_v52 = vmul.f32 %v1804_v39, %v261_v36  ;;  %v1823_v60 = vld [vmem:[#allocation6 + $0x30] sm:$0xff] }
  0x41   :  { %1417 = vmatpush3.msra.mxu1 %v824_v2  ;;  %1381 = vmatpush3.msra.mxu0 %v791_v10  ;;  %v283_v53 = vsub.f32 %v1746_v4, %v1718_v55  ;;  %v1821_v54 = vrot.slane %v1778_v29, %v1710_v45  ;;  %v259_v1 = vmul.f32 %v257_v43, %v209_v20 }
  0x42   :  { %1418 = vmatprep.subr.mxu1 %v839_v8  ;;  %1382 = vmatprep.subr.mxu0 %v806_v16  ;;  %v279_v2 = vmul.f32 %v1814_v47, %v1808_v40  ;;  %v1829_v7 = vrot.slane %v1799_v37, %v1708_v44  ;;  %v1833_v8 = vrot.slane %v1799_v37, %v1710_v45 }
  0x43   :  { %1419 = vmatpush3.msra.mxu1 %v823_v11  ;;  %1383 = vmatpush3.msra.mxu0 %v790_v21  ;;  %v249_v9 = vadd.f32 %v247_v49, %v237_v42  ;;  %v269_v10 = vmul.f32 %v267_v52, %v211_v24  ;;  %v289_v11 = vmul.f32 %v1821_v54, %v283_v53 }
  0x44   :  { %1420 = vmatprep.subr.mxu1 %v838_v17  ;;  %1384 = vmatprep.subr.mxu0 %v805_v27  ;;  %v1838_v13 = vrot.slane %v1799_v37, %v1712_v46  ;;  %v281_v14 = vmul.f32 %v279_v2, %v211_v24  ;;  %v453_v15 = vmul.f32 %v1829_v7, %v1774_v25 }
  0x45   :  { %1421 = vmatpush3.msra.mxu1 %v822_v22  ;;  %1385 = vmatpush3.msra.mxu0 %v789_v33  ;;  %v461_v16 = vmul.f32 %v1833_v8, %v261_v36  ;;  %v1845_v17 = vrot.slane %v1799_v37, %v1714_v50  ;;  %v271_v18 = vadd.f32 %v269_v10, %v259_v1 }
  0x46   :  { %1422 = vmatprep.subr.mxu1 %v837_v28  ;;  %1430 = vmatprep.subr.mxu0 %v884_v48  ;;  %v291_v19 = vmul.f32 %v289_v11, %v1781_v30  ;;  %v471_v20 = vmul.f32 %v1838_v13, %v1789_v32  ;;  %v1852_v21 = vrot.slane %v1823_v60, %v1712_v46 }
  0x47   :  { %1423 = vmatpush3.msra.mxu1 %v821_v41  ;;  %v455_v22 = vmul.f32 %v453_v15, %v249_v9  ;;  %v479_v24 = vmul.f32 %v1845_v17, %v283_v53  ;;  %v1857_v26 = vrot.slane %v1823_v60, %v1714_v50  ;;  %v1861_v27 = vrot.slane %v1720_v56, %v1724_v58 }
  0x48   :  { %1468 = vmatprep.subr.mxu1 %v916_v59  ;;  %v293_v28 = vadd.f32 %v291_v19, %v281_v14  ;;  %v463_v33 = vmul.f32 %v461_v16, %v271_v18  ;;  %v473_v34 = vmul.f32 %v471_v20, %v271_v18  ;;  %v615_v36 = vmul.f32 %v1852_v21, %v1774_v25  ;;  %v1567_v14 = vpop.eup %1566 }
  0x49   :  { %v623_v38 = vmul.f32 %v1857_v26, %v283_v53  ;;  %vm141_vm5 = vcmp.ge.f32.partialorder %v1718_v55, %v1861_v27  ;;  %v1870_v41 = vrot.slane %v1720_v56, %v1738_v0  ;;  %v1874_v42 = vrot.slane %v1720_v56, %v1748_v5 }
  0x4a   :  { %v465_v43 = vadd.f32 %v463_v33, %v455_v22  ;;  %v481_v48 = vmul.f32 %v479_v24, %v293_v28  ;;  %v1340_v49 = vsel %vm141_vm5, 1.0, %v2461_v12  ;;  %v1879_v25 = vsub.f32 %v1718_v55, %v1742_v3 }
  0x4b   :  { %2503 = vst [vmem:[#allocation20_spill] sm:$0xff] %v1874_v42  ;;  %vm151_vm6 = vcmp.ge.f32.partialorder %v1718_v55, %v1870_v41  ;;  %vm161_vm7 = vcmp.ge.f32.partialorder %v1718_v55, %v1874_v42  ;;  %v215_v52 = vsub.f32 %v1770_v23, %v1340_v49  ;;  %v1888_v56 = vrot.slane %v1778_v29, %v1712_v46 }
  0x4c   :  { %v1890_v53 = vadd.f32 %v481_v48, %v473_v34  ;;  %v617_v59 = vmul.f32 %v615_v36, %v465_v43  ;;  %v1342_v1 = vsel %vm151_vm6, 1.0, %v2461_v12  ;;  %v1894_v2 = vsel %vm161_vm7, 1.0, %v2461_v12 }
  0x4d   :  { %2504 = vst [vmem:[#allocation21_spill] sm:$0xff] %v1894_v2  ;;  %v217_v9 = vsub.f32 %v1340_v49, %v1342_v1  ;;  %v1897_v10 = vsub.f32 %v1342_v1, %v1894_v2  ;;  %v301_v11 = vmul.f32 %v1888_v56, %v1879_v25  ;;  %v1903_v23 = vsub.f32 %v1861_v27, %v1718_v55 }
  0x4e   :  { %v625_v15 = vmul.f32 %v623_v38, %v1890_v53  ;;  %v1908_v16 = vrot.slane %v1778_v29, %v1714_v50  ;;  %v1912_v18 = vsub.f32 %v1718_v55, %v1746_v4  ;;  %v1916_v19 = vrot.slane %v1778_v29, %v1716_v51  ;;  %v1954_v50 = vld [vmem:[#allocation6 + $0x28] sm:$0xff] }
  0x4f   :  { %v303_v20 = vmul.f32 %v301_v11, %v1781_v30  ;;  %v327_v22 = vsub.f32 %v1870_v41, %v1718_v55  ;;  %v1923_v24 = vrot.slane %v1778_v29, %v1724_v58  ;;  %v1927_v33 = vsub.f32 %v1718_v55, %v1861_v27 }
  0x50   :  { %2505 = vst [vmem:[#allocation22_spill] sm:$0xff] %v1912_v18  ;;  %v627_v34 = vadd.f32 %v625_v15, %v617_v59  ;;  %v311_v36 = vmul.f32 %v1908_v16, %v1903_v23  ;;  %v323_v38 = vmul.f32 %v1916_v19, %v1912_v18  ;;  %v1935_v30 = vrot.slane %v1778_v29, %v1738_v0 }
  0x51   :  { %2506 = vst [vmem:[#allocation23_spill] sm:$0xff] %v1927_v33  ;;  %v333_v43 = vmul.f32 %v1923_v24, %v327_v22  ;;  %v349_v48 = vsub.f32 %v1874_v42, %v1718_v55  ;;  %v1942_v49 = vrot.slane %v1778_v29, %v1748_v5  ;;  %v1946_v59 = vrot.slane %v1799_v37, %v1716_v51 }
  0x52   :  { %2507 = vst [vmem:[#allocation24_spill] sm:$0xff] %v1935_v30  ;;  %997 = vmatprep.mubr.f32.mxu0 %v627_v34  ;;  %v313_v1 = vmul.f32 %v311_v36, %v215_v52  ;;  %v325_v11 = vmul.f32 %v323_v38, %v215_v52  ;;  %v345_v15 = vmul.f32 %v1935_v30, %v1927_v33 }
  0x53   :  { %2508 = vst [vmem:[#allocation25_spill] sm:$0xff] %v1942_v49  ;;  %2509 = vst [vmem:[#allocation26_spill] sm:$0xff] %v1946_v59  ;;  %v1952_v12 = vrot.slane %v1799_v37, %v1724_v58  ;;  %v335_v42 = vmul.f32 %v333_v43, %v217_v9  ;;  %v355_v29 = vmul.f32 %v1942_v49, %v349_v48 }
  0x54   :  { %v489_v46 = vmul.f32 %v1946_v59, %v1808_v40  ;;  %v1961_v34 = vrot.slane %v1799_v37, %v1738_v0  ;;  %v315_v52 = vadd.f32 %v313_v1, %v303_v20  ;;  %v347_v36 = vmul.f32 %v345_v15, %v217_v9 }
  0x55   :  { %v497_v38 = vmul.f32 %v1952_v12, %v1903_v23  ;;  %v1967_v30 = vrot.slane %v1799_v37, %v1748_v5  ;;  %v337_v33 = vadd.f32 %v335_v42, %v325_v11  ;;  %v357_v43 = vmul.f32 %v355_v29, %v1897_v10 }
  0x56   :  { %v491_v49 = vmul.f32 %v489_v46, %v293_v28  ;;  %v507_v2 = vmul.f32 %v1961_v34, %v1879_v25  ;;  %v1977_v9 = vrot.slane %v1954_v50, %v1708_v44  ;;  %v1981_v37 = vrot.slane %v1954_v50, %v1710_v45 }
  0x57   :  { %v499_v59 = vmul.f32 %v497_v38, %v315_v52  ;;  %v515_v20 = vmul.f32 %v1967_v30, %v327_v22  ;;  %v1983_v42 = vadd.f32 %v357_v43, %v347_v36  ;;  %v1987_v46 = vrot.slane %v1823_v60, %v1738_v0 }
  0x58   :  { %2510 = vst [vmem:[#allocation27_spill] sm:$0xff] %v1977_v9  ;;  %2511 = vst [vmem:[#allocation28_spill] sm:$0xff] %v1981_v37  ;;  %v509_v1 = vmul.f32 %v507_v2, %v315_v52  ;;  %v1991_v28 = vrot.slane %v1823_v60, %v1748_v5  ;;  %v525_v29 = vmul.f32 %v1977_v9, %v1912_v18  ;;  %v77_v9 = vadd.f32 1.0, %v1567_v14 }
  0x59   :  { %2512 = vst [vmem:[#allocation29_spill] sm:$0xff] %v1983_v42  ;;  %v501_v11 = vadd.f32 %v499_v59, %v491_v49  ;;  %v517_v15 = vmul.f32 %v515_v20, %v337_v33  ;;  %v533_v38 = vmul.f32 %v1981_v37, %v349_v48  ;;  %v651_v36 = vmul.f32 %v1987_v46, %v1808_v40 }
  0x5a   :  { %v659_v2 = vmul.f32 %v1991_v28, %v327_v22  ;;  %v2001_v52 = vrot.slane %v1972_v57, %v1708_v44  ;;  %v2005_v43 = vrot.slane %v1972_v57, %v1710_v45  ;;  %v527_v59 = vmul.f32 %v525_v29, %v337_v33 }
  0x5b   :  { %v519_v49 = vadd.f32 %v517_v15, %v509_v1  ;;  %v535_v20 = vmul.f32 %v533_v38, %v1983_v42  ;;  %v653_v5 = vmul.f32 %v651_v36, %v501_v11  ;;  %v2013_v22 = vrot.slane %v1823_v60, %v1716_v51  ;;  %v2021_v1 = vld [vmem:[#allocation3 + $0x8] sm:$0xff] }
  0x5c   :  { %2513 = vst [vmem:[#allocation30_spill] sm:$0xff] %v2001_v52  ;;  %2514 = vst [vmem:[#allocation31_spill] sm:$0xff] %v2005_v43  ;;  %v669_v37 = vmul.f32 %v2001_v52, %v1879_v25  ;;  %v677_v40 = vmul.f32 %v2005_v43, %v349_v48  ;;  %1568 = vrcp.f32 %v77_v9  ;;  %v2019_v33 = vrot.slane %v1823_v60, %v1724_v58 }
  0x5d   :  { %v2015_v0 = vadd.f32 %v535_v20, %v527_v59  ;;  %v661_v18 = vmul.f32 %v659_v2, %v519_v49  ;;  %v633_v14 = vmul.f32 %v2013_v22, %v1789_v32  ;;  %vm92_vm8 = vcmp.ge.f32.partialorder %v2021_v1, %v1728_v61 }
  0x5e   :  { %vm102_vm9 = vcmp.ge.f32.partialorder %v2021_v1, %v1732_v62  ;;  %v2029_v48 = vmul.f32 %v669_v37, %v519_v49  ;;  %v641_v9 = vmul.f32 %v2019_v33, %v1903_v23  ;;  %v2516_v15 = vmov 0.0   ;;  %v900_v49 = vld [vmem:[#allocation8 + $0x378] sm:$0xff] }
  0x5f   :  { %2515 = vst [vmem:[#allocation32_spill] sm:$0xff] %v2015_v0  ;;  %v663_v25 = vadd.f32 %v661_v18, %v653_v5  ;;  %v1331_v60 = vsel %vm92_vm8, 1.0, %v2516_v15  ;;  %v635_v29 = vmul.f32 %v633_v14, %v1890_v53  ;;  %v1333_v38 = vsel %vm102_vm9, 1.0, %v2516_v15 }
  0x60   :  { %vm112_vm10 = vcmp.ge.f32.partialorder %v2021_v1, %v1736_v63  ;;  %vm122_vm11 = vcmp.ge.f32.partialorder %v2021_v1, %v1742_v3  ;;  %v2041_v32 = vmul.f32 %v677_v40, %v2015_v0  ;;  %v643_v5 = vmul.f32 %v641_v9, %v501_v11  ;;  %v915_v40 = vld [vmem:[#allocation8 + $0x3f0] sm:$0xff] }
  0x61   :  { %1072 = vmatprep.mubr.f32.mxu1 %v663_v25  ;;  %v1335_v18 = vsel %vm112_vm10, 1.0, %v2516_v15  ;;  %v1337_v23 = vsel %vm122_vm11, 1.0, %v2516_v15  ;;  %vm132_vm12 = vcmp.ge.f32.partialorder %v2021_v1, %v1746_v4  ;;  %v208_v53 = vsub.f32 %v1331_v60, %v1333_v38 }
  0x62   :  { %v210_v37 = vsub.f32 %v1333_v38, %v1335_v18  ;;  %v212_v36 = vsub.f32 %v1335_v18, %v1337_v23  ;;  %v645_v2 = vadd.f32 %v643_v5, %v635_v29  ;;  %v1339_v59 = vsel %vm132_vm12, 1.0, %v2516_v15  ;;  %v899_v29 = vld [vmem:[#allocation8 + $0x370] sm:$0xff] }
  0x63   :  { %v230_v20 = vsub.f32 %v2021_v1, %v1728_v61  ;;  %v240_v11 = vsub.f32 %v1736_v63, %v2021_v1  ;;  %v2052_v14 = vsub.f32 %v1337_v23, %v1339_v59  ;;  %v2056_v25 = vsub.f32 %v2021_v1, %v1732_v62  ;;  %v914_v62 = vld [vmem:[#allocation8 + $0x3e8] sm:$0xff] }
  0x64   :  { %v262_v9 = vsub.f32 %v1742_v3, %v2021_v1  ;;  %v2062_v60 = vsub.f32 %v2021_v1, %v1736_v63  ;;  %1073 = vmatmul.mubr.f32.vlgmr.msra.gmra.mxu1 %v645_v2  ;;  %v284_v5 = vsub.f32 %v1746_v4, %v2021_v1  ;;  %vm142_vm13 = vcmp.ge.f32.partialorder %v2021_v1, %v1861_v27 }
  0x65   :  { %v236_v61 = vmul.f32 %v1752_v6, %v230_v20  ;;  %v246_v38 = vmul.f32 %v1785_v31, %v240_v11  ;;  %v454_v18 = vmul.f32 %v1829_v7, %v230_v20  ;;  %1469 = vmatpush3.msra.mxu1 %v900_v49  ;;  %v258_v23 = vmul.f32 %v1795_v35, %v2056_v25  ;;  %v898_v6 = vld [vmem:[#allocation8 + $0x368] sm:$0xff]  ;;  %v913_v49 = vld [vmem:[#allocation8 + $0x3e0] sm:$0xff] }
  0x66   :  { %v268_v43 = vmul.f32 %v1804_v39, %v262_v9  ;;  %v280_v63 = vmul.f32 %v1814_v47, %v2062_v60  ;;  %v462_v2 = vmul.f32 %v1833_v8, %v262_v9  ;;  %1470 = vmatprep.subr.mxu1 %v915_v40  ;;  %v290_v52 = vmul.f32 %v1821_v54, %v284_v5  ;;  %v897_v47 = vld [vmem:[#allocation8 + $0x360] sm:$0xff]  ;;  %v912_v9 = vld [vmem:[#allocation8 + $0x3d8] sm:$0xff] }
  0x67   :  { %v238_v31 = vmul.f32 %v236_v61, %v208_v53  ;;  %v248_v11 = vmul.f32 %v246_v38, %v210_v37  ;;  %v472_v7 = vmul.f32 %v1838_v13, %v2056_v25  ;;  %1471 = vmatpush3.msra.mxu1 %v899_v29  ;;  %v260_v58 = vmul.f32 %v258_v23, %v210_v37 }
  0x68   :  { %v270_v35 = vmul.f32 %v268_v43, %v212_v36  ;;  %v282_v0 = vmul.f32 %v280_v63, %v212_v36  ;;  %v480_v39 = vmul.f32 %v1845_v17, %v284_v5  ;;  %1472 = vmatprep.subr.mxu1 %v914_v62  ;;  %v292_v8 = vmul.f32 %v290_v52, %v2052_v14  ;;  %v868_v43 = vld [vmem:[#allocation8 + $0x278] sm:$0xff]  ;;  %v895_v62 = vld [vmem:[#allocation8 + $0x350] sm:$0xff] }
  0x69   :  { %v250_v42 = vadd.f32 %v248_v11, %v238_v31  ;;  %v616_v53 = vmul.f32 %v1852_v21, %v230_v20  ;;  %v624_v40 = vmul.f32 %v1857_v26, %v284_v5  ;;  %v1569_v54 = vpop.eup %1568  ;;  %1473 = vmatpush3.msra.mxu1 %v898_v6  ;;  %vm152_vm14 = vcmp.ge.f32.partialorder %v2021_v1, %v1870_v41  ;;  %v896_v21 = vld [vmem:[#allocation8 + $0x358] sm:$0xff]  ;;  %v911_v20 = vld [vmem:[#allocation8 + $0x3d0] sm:$0xff]  ;;  %v866_v11 = vld [vmem:[#allocation8 + $0x268] sm:$0xff] }
  0x6a   :  { %v272_v13 = vadd.f32 %v270_v35, %v260_v58  ;;  %v2088_v17 = vsub.f32 %v2021_v1, %v1742_v3  ;;  %v83_v52 = vmul.f32 %v1569_v54, %v1718_v55  ;;  %1474 = vmatprep.subr.mxu1 %v913_v49  ;;  %v294_v26 = vadd.f32 %v292_v8, %v282_v0  ;;  %v883_v58 = vld [vmem:[#allocation8 + $0x2f0] sm:$0xff] }
  0x6b   :  { %v456_v37 = vmul.f32 %v454_v18, %v250_v42  ;;  %v1341_v36 = vsel %vm142_vm13, 1.0, %v2516_v15  ;;  %1475 = vmatpush3.msra.mxu1 %v897_v47  ;;  %v2093_v38 = vsel %vm152_vm14, 1.0, %v2516_v15  ;;  %v867_v3 = vld [vmem:[#allocation8 + $0x270] sm:$0xff]  ;;  %v1329_v42 = vmul.f32 -1.442695, %v2021_v1  ;;  %v882_v18 = vld [vmem:[#allocation8 + $0x2e8] sm:$0xff] }
  0x6c   :  { %v464_v29 = vmul.f32 %v462_v2, %v272_v13  ;;  %v474_v61 = vmul.f32 %v472_v7, %v272_v13  ;;  %v216_v5 = vsub.f32 %v1339_v59, %v1341_v36  ;;  %998 = vmatmul.mubr.f32.vlgmr.msra.gmra.mxu0 %v83_v52  ;;  %1476 = vmatprep.subr.mxu1 %v912_v9  ;;  %v910_v2 = vld [vmem:[#allocation8 + $0x3c8] sm:$0xff]  ;;  %v909_v47 = vld [vmem:[#allocation8 + $0x3c0] sm:$0xff] }
  0x6d   :  { %v482_v23 = vmul.f32 %v480_v39, %v294_v26  ;;  %v2096_v63 = vsub.f32 %v1341_v36, %v2093_v38  ;;  %v302_v0 = vmul.f32 %v1888_v56, %v2088_v17  ;;  %1431 = vmatpush3.msra.mxu0 %v868_v43  ;;  %1477 = vmatpush3.msra.mxu1 %v896_v21  ;;  %v894_v7 = vld [vmem:[#allocation8 + $0x348] sm:$0xff]  ;;  %1570 = vpow2.f32 %v1329_v42  ;;  %v881_v39 = vld [vmem:[#allocation8 + $0x2e0] sm:$0xff]  ;;  %v2517_v43 = vld [vmem:[#allocation26_spill] sm:$0xff] }
  0x6e   :  { %v466_v6 = vadd.f32 %v464_v29, %v456_v37  ;;  %v2103_v59 = vsub.f32 %v1861_v27, %v2021_v1  ;;  %v2107_v31 = vsub.f32 %v2021_v1, %v1746_v4  ;;  %1432 = vmatprep.subr.mxu0 %v883_v58  ;;  %1478 = vmatprep.subr.mxu1 %v911_v20  ;;  %v865_v9 = vld [vmem:[#allocation8 + $0x260] sm:$0xff]  ;;  %v880_v37 = vld [vmem:[#allocation8 + $0x2d8] sm:$0xff] }
  0x6f   :  { %v2109_v56 = vadd.f32 %v482_v23, %v474_v61  ;;  %v304_v49 = vmul.f32 %v302_v0, %v2052_v14  ;;  %v328_v35 = vsub.f32 %v1870_v41, %v2021_v1  ;;  %1433 = vmatpush3.msra.mxu0 %v867_v3  ;;  %1479 = vmatpush3.msra.mxu1 %v895_v62  ;;  %v893_v13 = vld [vmem:[#allocation8 + $0x340] sm:$0xff]  ;;  %v864_v58 = vld [vmem:[#allocation8 + $0x258] sm:$0xff]  ;;  %v879_v61 = vld [vmem:[#allocation8 + $0x2d0] sm:$0xff] }
  0x70   :  { %v618_v8 = vmul.f32 %v616_v53, %v466_v6  ;;  %v312_v4 = vmul.f32 %v1908_v16, %v2103_v59  ;;  %v324_v54 = vmul.f32 %v1916_v19, %v2107_v31  ;;  %1434 = vmatprep.subr.mxu0 %v882_v18  ;;  %1480 = vmatprep.subr.mxu1 %v910_v2  ;;  %v908_v53 = vld [vmem:[#allocation8 + $0x3b8] sm:$0xff]  ;;  %v907_v3 = vld [vmem:[#allocation8 + $0x3b0] sm:$0xff]  ;;  %v878_v2 = vld [vmem:[#allocation8 + $0x2c8] sm:$0xff] }
  0x71   :  { %v626_v14 = vmul.f32 %v624_v40, %v2109_v56  ;;  %v334_v52 = vmul.f32 %v1923_v24, %v328_v35  ;;  %v490_v21 = vmul.f32 %v2517_v43, %v2062_v60  ;;  %1435 = vmatpush3.msra.mxu0 %v866_v11  ;;  %1481 = vmatpush3.msra.mxu1 %v894_v7  ;;  %v892_v20 = vld [vmem:[#allocation8 + $0x338] sm:$0xff]  ;;  %v891_v0 = vld [vmem:[#allocation8 + $0x330] sm:$0xff]  ;;  %v906_v6 = vld [vmem:[#allocation8 + $0x3a8] sm:$0xff] }
  0x72   :  { %v314_v36 = vmul.f32 %v312_v4, %v216_v5  ;;  %v326_v16 = vmul.f32 %v324_v54, %v216_v5  ;;  %v498_v19 = vmul.f32 %v1952_v12, %v2103_v59  ;;  %1436 = vmatprep.subr.mxu0 %v881_v39  ;;  %1482 = vmatprep.subr.mxu1 %v909_v47  ;;  %v863_v12 = vld [vmem:[#allocation8 + $0x250] sm:$0xff]  ;;  %v890_v39 = vld [vmem:[#allocation8 + $0x328] sm:$0xff]  ;;  %v861_v54 = vld [vmem:[#allocation8 + $0x240] sm:$0xff] }
  0x73   :  { %v2124_v29 = vadd.f32 %v626_v14, %v618_v8  ;;  %v336_v24 = vmul.f32 %v334_v52, %v2096_v63  ;;  %v492_v40 = vmul.f32 %v490_v21, %v294_v26  ;;  %1437 = vmatpush3.msra.mxu0 %v865_v9  ;;  %1483 = vmatpush3.msra.mxu1 %v893_v13  ;;  %v905_v8 = vld [vmem:[#allocation8 + $0x3a0] sm:$0xff]  ;;  %v876_v13 = vld [vmem:[#allocation8 + $0x2b8] sm:$0xff] }
  0x74   :  { %v316_v62 = vadd.f32 %v314_v36, %v304_v49  ;;  %v508_v5 = vmul.f32 %v1961_v34, %v2088_v17  ;;  %v516_v23 = vmul.f32 %v1967_v30, %v328_v35  ;;  %1438 = vmatprep.subr.mxu0 %v880_v37  ;;  %1484 = vmatprep.subr.mxu1 %v908_v53  ;;  %v2137_v34 = vld [vmem:[#allocation6 + $0x18] sm:$0xff]  ;;  %v862_v49 = vld [vmem:[#allocation8 + $0x248] sm:$0xff]  ;;  %v889_v9 = vld [vmem:[#allocation8 + $0x320] sm:$0xff] }
  0x75   :  { %v2130_v42 = vadd.f32 %v336_v24, %v326_v16  ;;  %v652_v18 = vmul.f32 %v1987_v46, %v2062_v60  ;;  %v660_v26 = vmul.f32 %v1991_v28, %v328_v35  ;;  %1439 = vmatpush3.msra.mxu0 %v864_v58  ;;  %1485 = vmatpush3.msra.mxu1 %v892_v20  ;;  %v2518_v28 = vld [vmem:[#allocation16_spill] sm:$0xff]  ;;  %v877_v35 = vld [vmem:[#allocation8 + $0x2c0] sm:$0xff]  ;;  %v860_v21 = vld [vmem:[#allocation8 + $0x238] sm:$0xff] }
  0x76   :  { %v500_v11 = vmul.f32 %v498_v19, %v316_v62  ;;  %v510_v7 = vmul.f32 %v508_v5, %v316_v62  ;;  %v634_v30 = vmul.f32 %v2013_v22, %v2056_v25  ;;  %1440 = vmatprep.subr.mxu0 %v879_v61  ;;  %1486 = vmatprep.subr.mxu1 %v907_v3  ;;  %v904_v53 = vld [vmem:[#allocation8 + $0x398] sm:$0xff]  ;;  %v2519_v36 = vld [vmem:[#allocation21_spill] sm:$0xff] }
  0x77   :  { %v518_v47 = vmul.f32 %v516_v23, %v2130_v42  ;;  %v642_v46 = vmul.f32 %v2019_v33, %v2103_v59  ;;  %v2144_v60 = vrot.slane %v2518_v28, %v1708_v44  ;;  %1441 = vmatpush3.msra.mxu0 %v863_v12  ;;  %1487 = vmatpush3.msra.mxu1 %v891_v0  ;;  %v875_v20 = vld [vmem:[#allocation8 + $0x2b0] sm:$0xff]  ;;  %v2520_v61 = vld [vmem:[#allocation14_spill] sm:$0xff]  ;;  %v2521_v0 = vld [vmem:[#allocation15_spill] sm:$0xff] }
  0x78   :  { %v502_v22 = vadd.f32 %v500_v11, %v492_v40  ;;  %v636_v25 = vmul.f32 %v634_v30, %v2109_v56  ;;  %v2149_v4 = vsub.f32 %v1718_v55, %v1870_v41  ;;  %1442 = vmatprep.subr.mxu0 %v878_v2  ;;  %1488 = vmatprep.subr.mxu1 %v906_v6  ;;  %v859_v62 = vld [vmem:[#allocation8 + $0x230] sm:$0xff]  ;;  %v888_v2 = vld [vmem:[#allocation8 + $0x318] sm:$0xff]  ;;  %v2522_v11 = vld [vmem:[#allocation23_spill] sm:$0xff] }
  0x79   :  { %v2151_v33 = vadd.f32 %v518_v47, %v510_v7  ;;  %vm171_vm15 = vcmp.ge.f32.partialorder %v1718_v55, %v2144_v60  ;;  %v2157_v59 = vrot.slane %v2137_v34, %v1708_v44  ;;  %1443 = vmatpush3.msra.mxu0 %v862_v49  ;;  %1489 = vmatpush3.msra.mxu1 %v890_v39  ;;  %v858_v30 = vld [vmem:[#allocation8 + $0x228] sm:$0xff]  ;;  %v903_v49 = vld [vmem:[#allocation8 + $0x390] sm:$0xff] }
  0x7a   :  { %v654_v56 = vmul.f32 %v652_v18, %v502_v22  ;;  %v644_v14 = vmul.f32 %v642_v46, %v502_v22  ;;  %v2160_v52 = vsel %vm171_vm15, 1.0, %v2516_v15  ;;  %v371_v43 = vsub.f32 %v2144_v60, %v1718_v55  ;;  %1444 = vmatprep.subr.mxu0 %v877_v35  ;;  %1490 = vmatprep.subr.mxu1 %v905_v8  ;;  %v1571_v58 = vpop.eup %1570  ;;  %v873_v46 = vld [vmem:[#allocation8 + $0x2a0] sm:$0xff]  ;;  %v887_v35 = vld [vmem:[#allocation8 + $0x310] sm:$0xff] }
  0x7b   :  { %v662_v37 = vmul.f32 %v660_v26, %v2151_v33  ;;  %v2167_v16 = vsub.f32 %v2519_v36, %v2160_v52  ;;  %v367_v19 = vmul.f32 %v2157_v59, %v2149_v4  ;;  %1445 = vmatpush3.msra.mxu0 %v861_v54  ;;  %1491 = vmatpush3.msra.mxu1 %v889_v9  ;;  %v78_v23 = vadd.f32 1.0, %v1571_v58  ;;  %v874_v26 = vld [vmem:[#allocation8 + $0x2a8] sm:$0xff]  ;;  %v2524_v9 = vld [vmem:[#allocation22_spill] sm:$0xff]  ;;  %v901_v58 = vld [vmem:[#allocation8 + $0x380] sm:$0xff] }
  0x7c   :  { %v646_v24 = vadd.f32 %v644_v14, %v636_v25  ;;  %v2173_v40 = vrot.slane %v2137_v34, %v1710_v45  ;;  %v2177_v3 = vrot.slane %v1954_v50, %v2520_v61  ;;  %1446 = vmatprep.subr.mxu0 %v876_v13  ;;  %1002 = vmatprep.mubr.f32.mxu0 %v2124_v29  ;;  %v857_v25 = vld [vmem:[#allocation8 + $0x220] sm:$0xff]  ;;  %v902_v54 = vld [vmem:[#allocation8 + $0x388] sm:$0xff] }
  0x7d   :  { %v664_v5 = vadd.f32 %v662_v37, %v654_v56  ;;  %v369_v12 = vmul.f32 %v367_v19, %v1897_v10  ;;  %v2183_v18 = vrot.slane %v1954_v50, %v2521_v0  ;;  %1447 = vmatpush3.msra.mxu0 %v860_v21  ;;  %1492 = vmatprep.subr.mxu1 %v904_v53  ;;  %1572 = vrcp.f32 %v78_v23  ;;  %v872_v21 = vld [vmem:[#allocation8 + $0x298] sm:$0xff]  ;;  %v886_v36 = vld [vmem:[#allocation8 + $0x308] sm:$0xff]  ;;  %v885_v23 = vld [vmem:[#allocation8 + $0x300] sm:$0xff] }
  0x7e   :  { %v377_v6 = vmul.f32 %v2173_v40, %v371_v43  ;;  %v543_v7 = vmul.f32 %v2177_v3, %v2522_v11  ;;  %v2190_v29 = vrot.slane %v1972_v57, %v2520_v61  ;;  %v2194_v10 = vadd.f32 %v2041_v32, %v2029_v48  ;;  %1448 = vmatprep.subr.mxu0 %v875_v20  ;;  %v2523_v32 = vld [vmem:[#allocation29_spill] sm:$0xff]  ;;  %v2525_v20 = vld [vmem:[#allocation20_spill] sm:$0xff] }
  0x7f   :  { %1077 = vmatprep.mubr.f32.mxu1 %v664_v5  ;;  %v2198_v39 = vrot.slane %v1972_v57, %v2521_v0  ;;  %v2202_v47 = vrot.slane %v1972_v57, %v1716_v51  ;;  %1449 = vmatpush3.msra.mxu0 %v859_v62  ;;  %v551_v22 = vmul.f32 %v2183_v18, %v371_v43  ;;  %v871_v5 = vld [vmem:[#allocation8 + $0x290] sm:$0xff] }
  0x80   :  { %1078 = vmatmul.mubr.f32.gmra.mxu1 %v646_v24  ;;  %v379_v48 = vmul.f32 %v377_v6, %v2167_v16  ;;  %v545_v8 = vmul.f32 %v543_v7, %v2523_v32  ;;  %1450 = vmatprep.subr.mxu0 %v874_v26  ;;  %v687_v13 = vmul.f32 %v2190_v29, %v2524_v9  ;;  %v854_v32 = vld [vmem:[#allocation8 + $0x208] sm:$0xff] }
  0x81   :  { %1493 = vmatpush3.msra.mxu1 %v888_v2  ;;  %v695_v56 = vmul.f32 %v2198_v39, %v371_v43  ;;  %v2212_v14 = vrot.slane %v2518_v28, %v1710_v45  ;;  %1451 = vmatpush3.msra.mxu0 %v858_v30  ;;  %v2218_v53 = vmul.f32 %v2202_v47, %v2522_v11  ;;  %v856_v43 = vld [vmem:[#allocation8 + $0x218] sm:$0xff]  ;;  %v855_v2 = vld [vmem:[#allocation8 + $0x210] sm:$0xff]  ;;  %v870_v30 = vld [vmem:[#allocation8 + $0x288] sm:$0xff] }
  0x82   :  { %1494 = vmatprep.subr.mxu1 %v903_v49  ;;  %v2214_v37 = vadd.f32 %v379_v48, %v369_v12  ;;  %v2222_v19 = vrot.slane %v2518_v28, %v2520_v61  ;;  %1452 = vmatprep.subr.mxu0 %v873_v46  ;;  %v2228_v24 = vsub.f32 %v1718_v55, %v2525_v20  ;;  %v2527_v46 = vld [vmem:[#allocation32_spill] sm:$0xff] }
  0x83   :  { %1495 = vmatpush3.msra.mxu1 %v887_v35  ;;  %vm181_vm0 = vcmp.ge.f32.partialorder %v1718_v55, %v2212_v14  ;;  %v2232_v62 = vrot.slane %v2137_v34, %v2520_v61  ;;  %1453 = vmatpush3.msra.mxu0 %v857_v25  ;;  %v393_v26 = vsub.f32 %v2212_v14, %v1718_v55 }
  0x84   :  { %2526 = vst [vmem:[#allocation26_spill] sm:$0xff] %v2228_v24  ;;  %1496 = vmatprep.subr.mxu1 %v902_v54  ;;  %v553_v28 = vmul.f32 %v551_v22, %v2214_v37  ;;  %v1348_v12 = vsel %vm181_vm0, 1.0, %v2516_v15  ;;  %vm191_vm1 = vcmp.ge.f32.partialorder %v1718_v55, %v2222_v19  ;;  %1454 = vmatprep.subr.mxu0 %v872_v21  ;;  %v2529_v21 = vld [vmem:[#allocation17_spill] sm:$0xff] }
  0x85   :  { %1497 = vmatpush3.msra.mxu1 %v886_v36  ;;  %v2241_v61 = vsel %vm191_vm1, 1.0, %v2516_v15  ;;  %v223_v6 = vsub.f32 %v2160_v52, %v1348_v12  ;;  %v389_v11 = vmul.f32 %v2232_v62, %v2228_v24  ;;  %v2248_v7 = vrot.slane %v2137_v34, %v2521_v0  ;;  %1455 = vmatpush3.msra.mxu0 %v856_v43 }
  0x86   :  { %v555_v49 = vadd.f32 %v553_v28, %v545_v8  ;;  %v689_v35 = vmul.f32 %v687_v13, %v2527_v46  ;;  %1498 = vmatprep.subr.mxu1 %v901_v58  ;;  %v2253_v48 = vsub.f32 %v1718_v55, %v2144_v60  ;;  %1456 = vmatprep.subr.mxu0 %v871_v5  ;;  %v869_v8 = vld [vmem:[#allocation8 + $0x280] sm:$0xff]  ;;  %v932_v28 = vld [vmem:[#allocation8 + $0x478] sm:$0xff] }
  0x87   :  { %1499 = vmatpush3.msra.mxu1 %v885_v23  ;;  %v391_v52 = vmul.f32 %v389_v11, %v2167_v16  ;;  %v399_v22 = vmul.f32 %v2248_v7, %v393_v26  ;;  %v2259_v25 = vrot.slane %v2137_v34, %v1716_v51  ;;  %1457 = vmatpush3.msra.mxu0 %v855_v2  ;;  %v853_v16 = vld [vmem:[#allocation8 + $0x200] sm:$0xff] }
  0x88   :  { %2528 = vst [vmem:[#allocation16_spill] sm:$0xff] %v2253_v48  ;;  %v697_v54 = vmul.f32 %v695_v56, %v555_v49  ;;  %v2262_v9 = vsub.f32 %v1348_v12, %v2241_v61  ;;  %v415_v13 = vsub.f32 %v2222_v19, %v1718_v55  ;;  %v2268_v36 = vrot.slane %v2137_v34, %v2529_v21  ;;  %v2530_v12 = vld [vmem:[#allocation18_spill] sm:$0xff]  ;;  %v2531_v11 = vld [vmem:[#allocation19_spill] sm:$0xff] }
  0x89   :  { %1458 = vmatprep.subr.mxu0 %v870_v30  ;;  %v401_v43 = vmul.f32 %v399_v22, %v223_v6  ;;  %v411_v58 = vmul.f32 %v2259_v25, %v2253_v48  ;;  %v2274_v5 = vrot.slane %v1954_v50, %v1716_v51  ;;  %v2278_v56 = vrot.slane %v1954_v50, %v2529_v21 }
  0x8a   :  { %1459 = vmatpush3.msra.mxu0 %v854_v32  ;;  %v699_v55 = vadd.f32 %v697_v54, %v689_v35  ;;  %v421_v23 = vmul.f32 %v2268_v36, %v415_v13  ;;  %v2283_v2 = vrot.slane %v1954_v50, %v2530_v12  ;;  %v2287_v30 = vrot.slane %v1954_v50, %v2531_v11  ;;  %v1573_v35 = vpop.eup %1572 }
  0x8b   :  { %1460 = vmatprep.subr.mxu0 %v869_v8  ;;  %v403_v51 = vadd.f32 %v401_v43, %v391_v52  ;;  %v413_v46 = vmul.f32 %v411_v58, %v223_v6  ;;  %v561_v22 = vmul.f32 %v2274_v5, %v2149_v4  ;;  %v569_v32 = vmul.f32 %v2278_v56, %v393_v26 }
  0x8c   :  { %1461 = vmatpush3.msra.mxu0 %v853_v16  ;;  %v423_v54 = vmul.f32 %v421_v23, %v2262_v9  ;;  %v579_v48 = vmul.f32 %v2283_v2, %v2228_v24  ;;  %v587_v45 = vmul.f32 %v2287_v30, %v415_v13  ;;  %v2298_v50 = vrot.slane %v1972_v57, %v2529_v21 }
  0x8d   :  { %v84_v6 = vmul.f32 %v1573_v35, %v2021_v1  ;;  %1524 = vmatprep.subr.mxu0 %v932_v28  ;;  %v563_v52 = vmul.f32 %v561_v22, %v2214_v37  ;;  %v571_v8 = vmul.f32 %v569_v32, %v403_v51  ;;  %v2304_v16 = vrot.slane %v1972_v57, %v2530_v12 }
  0x8e   :  { %v2306_v43 = vadd.f32 %v423_v54, %v413_v46  ;;  %v581_v58 = vmul.f32 %v579_v48, %v403_v51  ;;  %v713_v23 = vmul.f32 %v2298_v50, %v393_v26  ;;  %v2311_v24 = vrot.slane %v1972_v57, %v2531_v11  ;;  %v931_v54 = vld [vmem:[#allocation8 + $0x470] sm:$0xff] }
  0x8f   :  { %1003 = vmatmul.mubr.f32.gmra.mxu0 %v84_v6  ;;  %v573_v21 = vadd.f32 %v571_v8, %v563_v52  ;;  %v723_v35 = vmul.f32 %v2304_v16, %v2149_v4  ;;  %vm162_vm2 = vcmp.ge.f32.partialorder %v2021_v1, %v2525_v20  ;;  %vm172_vm3 = vcmp.ge.f32.partialorder %v2021_v1, %v2144_v60  ;;  %v2535_v52 = vld [vmem:[#allocation24_spill] sm:$0xff] }
  0x90   :  { %2532 = vst [vmem:[#allocation21_spill] sm:$0xff] %v2306_v43  ;;  %1147 = vmatprep.mubr.f32.mxu0 %v699_v55  ;;  %v589_v37 = vmul.f32 %v587_v45, %v2306_v43  ;;  %v731_v26 = vmul.f32 %v2311_v24, %v415_v13  ;;  %v1345_v48 = vsel %vm162_vm2, 1.0, %v2516_v15  ;;  %v1347_v57 = vsel %vm172_vm3, 1.0, %v2516_v15 }
  0x91   :  { %v707_v51 = vmul.f32 %v2218_v53, %v555_v49  ;;  %v715_v46 = vmul.f32 %v713_v23, %v573_v21  ;;  %v725_v22 = vmul.f32 %v723_v35, %v573_v21  ;;  %v220_v4 = vsub.f32 %v2093_v38, %v1345_v48  ;;  %v2534_v49 = vld [vmem:[#allocation27_spill] sm:$0xff] }
  0x92   :  { %v2325_v32 = vadd.f32 %v589_v37, %v581_v58  ;;  %v2329_v55 = vsub.f32 %v2021_v1, %v1861_v27  ;;  %v350_v45 = vsub.f32 %v2525_v20, %v2021_v1  ;;  %v2335_v13 = vsub.f32 %v2021_v1, %v1870_v41  ;;  %v2536_v58 = vld [vmem:[#allocation25_spill] sm:$0xff]  ;;  %v2537_v37 = vld [vmem:[#allocation28_spill] sm:$0xff] }
  0x93   :  { %1148 = vmatmul.mubr.f32.vlgmr.msra.gmra.mxu0 %v2194_v10  ;;  %v2338_v53 = vsub.f32 %v1345_v48, %v1347_v57  ;;  %v372_v38 = vsub.f32 %v2144_v60, %v2021_v1  ;;  %v526_v6 = vmul.f32 %v2534_v49, %v2107_v31  ;;  %v930_v10 = vld [vmem:[#allocation8 + $0x468] sm:$0xff]  ;;  %v717_v21 = vadd.f32 %v715_v46, %v707_v51  ;;  %v929_v46 = vld [vmem:[#allocation8 + $0x460] sm:$0xff] }
  0x94   :  { %2533 = vst [vmem:[#allocation14_spill] sm:$0xff] %v2325_v32  ;;  %v733_v27 = vmul.f32 %v731_v26, %v2325_v32  ;;  %1525 = vmatpush3.msra.mxu0 %v932_v28  ;;  %v346_v8 = vmul.f32 %v2535_v52, %v2329_v55  ;;  %v356_v23 = vmul.f32 %v2536_v58, %v350_v45 }
  0x95   :  { %v368_v41 = vmul.f32 %v2157_v59, %v2335_v13  ;;  %1526 = vmatprep.subr.mxu0 %v931_v54  ;;  %v378_v35 = vmul.f32 %v2173_v40, %v372_v38  ;;  %v534_v48 = vmul.f32 %v2537_v37, %v350_v45  ;;  %v544_v49 = vmul.f32 %v2177_v3, %v2329_v55  ;;  %v2538_v37 = vld [vmem:[#allocation30_spill] sm:$0xff] }
  0x96   :  { %v735_v26 = vadd.f32 %v733_v27, %v725_v22  ;;  %v348_v28 = vmul.f32 %v346_v8, %v2096_v63  ;;  %v358_v32 = vmul.f32 %v356_v23, %v220_v4  ;;  %1527 = vmatpush3.msra.mxu0 %v931_v54  ;;  %v528_v59 = vmul.f32 %v526_v6, %v2130_v42  ;;  %v928_v22 = vld [vmem:[#allocation8 + $0x458] sm:$0xff] }
  0x97   :  { %v370_v52 = vmul.f32 %v368_v41, %v220_v4  ;;  %v380_v58 = vmul.f32 %v378_v35, %v2338_v53  ;;  %v552_v51 = vmul.f32 %v2183_v18, %v372_v38  ;;  %1528 = vmatprep.subr.mxu0 %v930_v10  ;;  %v670_v43 = vmul.f32 %v2538_v37, %v2088_v17  ;;  %v2539_v17 = vld [vmem:[#allocation31_spill] sm:$0xff]  ;;  %v926_v35 = vld [vmem:[#allocation8 + $0x448] sm:$0xff] }
  0x98   :  { %1222 = vmatprep.mubr.f32.mxu1 %v735_v26  ;;  %v360_v40 = vadd.f32 %v358_v32, %v348_v28  ;;  %vm182_vm4 = vcmp.ge.f32.partialorder %v2021_v1, %v2212_v14  ;;  %vm192_vm5 = vcmp.ge.f32.partialorder %v2021_v1, %v2222_v19  ;;  %v688_v42 = vmul.f32 %v2190_v29, %v2107_v31  ;;  %v927_v29 = vld [vmem:[#allocation8 + $0x450] sm:$0xff] }
  0x99   :  { %1223 = vmatmul.mubr.f32.vlgmr.msra.gmra.mxu1 %v717_v21  ;;  %v382_v63 = vadd.f32 %v380_v58, %v370_v52  ;;  %v696_v3 = vmul.f32 %v2198_v39, %v372_v38  ;;  %v1349_v18 = vsel %vm182_vm4, 1.0, %v2516_v15  ;;  %1529 = vmatpush3.msra.mxu0 %v930_v10  ;;  %v678_v54 = vmul.f32 %v2539_v17, %v350_v45  ;;  %v1575_v17 = vld [vmem:[#allocation3] sm:$0xff] }
  0x9a   :  { %v536_v4 = vmul.f32 %v534_v48, %v360_v40  ;;  %v546_v32 = vmul.f32 %v544_v49, %v360_v40  ;;  %v2370_v6 = vsel %vm192_vm5, 1.0, %v2516_v15  ;;  %1530 = vmatprep.subr.mxu0 %v929_v46  ;;  %v224_v8 = vsub.f32 %v1347_v57, %v1349_v18  ;;  %v1574_v48 = vld [vmem:[#allocation6 + $0x8] sm:$0xff] }
  0x9b   :  { %v554_v27 = vmul.f32 %v552_v51, %v382_v63  ;;  %v2374_v23 = vsub.f32 %v2021_v1, %v2525_v20  ;;  %v394_v31 = vsub.f32 %v2212_v14, %v2021_v1  ;;  %1531 = vmatpush3.msra.mxu0 %v929_v46  ;;  %v672_v38 = vmul.f32 %v670_v43, %v2151_v33 }
  0x9c   :  { %v538_v39 = vadd.f32 %v536_v4, %v528_v59  ;;  %v2381_v45 = vsub.f32 %v2021_v1, %v2144_v60  ;;  %v416_v41 = vsub.f32 %v2222_v19, %v2021_v1  ;;  %1532 = vmatprep.subr.mxu0 %v928_v22  ;;  %v2386_v20 = vsub.f32 %v1349_v18, %v2370_v6  ;;  %v923_v4 = vld [vmem:[#allocation8 + $0x430] sm:$0xff] }
  0x9d   :  { %v556_v57 = vadd.f32 %v554_v27, %v546_v32  ;;  %v390_v10 = vmul.f32 %v2232_v62, %v2374_v23  ;;  %v400_v21 = vmul.f32 %v2248_v7, %v394_v31  ;;  %1533 = vmatpush3.msra.mxu0 %v928_v22  ;;  %v2392_v60 = vrot.slane %v1574_v48, %v2521_v0  ;;  %v925_v7 = vld [vmem:[#allocation8 + $0x440] sm:$0xff]  ;;  %v922_v27 = vld [vmem:[#allocation8 + $0x428] sm:$0xff] }
  0x9e   :  { %v690_v33 = vmul.f32 %v688_v42, %v538_v39  ;;  %v680_v43 = vmul.f32 %v678_v54, %v538_v39  ;;  %v412_v19 = vmul.f32 %v2259_v25, %v2381_v45  ;;  %1534 = vmatprep.subr.mxu0 %v927_v29  ;;  %v422_v62 = vmul.f32 %v2268_v36, %v416_v41  ;;  %v924_v42 = vld [vmem:[#allocation8 + $0x438] sm:$0xff]  ;;  %v1576_v54 = vld [vmem:[#allocation6 + $0x30] sm:$0xff] }
  0x9f   :  { %v698_v49 = vmul.f32 %v696_v3, %v556_v57  ;;  %v392_v26 = vmul.f32 %v390_v10, %v2338_v53  ;;  %v402_v28 = vmul.f32 %v400_v21, %v224_v8  ;;  %1535 = vmatpush3.msra.mxu0 %v927_v29  ;;  %v562_v46 = vmul.f32 %v2274_v5, %v2335_v13 }
  0xa0   :  { %v682_v52 = vadd.f32 %v680_v43, %v672_v38  ;;  %v414_v58 = vmul.f32 %v412_v19, %v224_v8  ;;  %1536 = vmatprep.subr.mxu0 %v926_v35  ;;  %v424_v0 = vmul.f32 %v422_v62, %v2386_v20  ;;  %v570_v25 = vmul.f32 %v2278_v56, %v394_v31  ;;  %v920_v19 = vld [vmem:[#allocation8 + $0x418] sm:$0xff] }
  0xa1   :  { %v700_v59 = vadd.f32 %v698_v49, %v690_v33  ;;  %v404_v51 = vadd.f32 %v402_v28, %v392_v26  ;;  %1537 = vmatpush3.msra.mxu0 %v926_v35  ;;  %v580_v53 = vmul.f32 %v2283_v2, %v2374_v23  ;;  %v588_v36 = vmul.f32 %v2287_v30, %v416_v41  ;;  %v2540_v49 = vld [vmem:[#allocation13_spill] sm:$0xff] }
  0xa2   :  { %1538 = vmatprep.subr.mxu0 %v925_v7  ;;  %vm202_vm6 = vcmp.ge.f32.partialorder %v2021_v1, %v2392_v60  ;;  %v2407_v40 = vadd.f32 %v424_v0, %v414_v58  ;;  %v564_v37 = vmul.f32 %v562_v46, %v382_v63  ;;  %v432_v5 = vrot.slane %v2137_v34, %v2530_v12  ;;  %v918_v58 = vld [vmem:[#allocation8 + $0x408] sm:$0xff]  ;;  %v2542_v0 = vld [vmem:[#allocation21_spill] sm:$0xff] }
  0xa3   :  { %1152 = vmatprep.mubr.f32.mxu0 %v700_v59  ;;  %v572_v3 = vmul.f32 %v570_v25, %v404_v51  ;;  %v582_v56 = vmul.f32 %v580_v53, %v404_v51  ;;  %v724_v2 = vmul.f32 %v2304_v16, %v2335_v13  ;;  %v428_v30 = vsub.f32 %v2021_v1, %v2212_v14 }
  0xa4   :  { %1153 = vmatmul.mubr.f32.gmra.mxu0 %v682_v52  ;;  %v590_v18 = vmul.f32 %v588_v36, %v2407_v40  ;;  %v732_v22 = vmul.f32 %v2311_v24, %v416_v41  ;;  %v706_v63 = vmul.f32 %v2202_v47, %v2329_v55  ;;  %v714_v12 = vmul.f32 %v2298_v50, %v394_v31  ;;  %v70_v50 = vld [vmem:[#allocation6 + $0x40] sm:$0x3]  ;;  %v921_v41 = vld [vmem:[#allocation8 + $0x420] sm:$0xff] }
  0xa5   :  { %1539 = vmatpush3.msra.mxu0 %v925_v7  ;;  %v574_v32 = vadd.f32 %v572_v3, %v564_v37  ;;  %vm201_vm7 = vcmp.ge.f32.partialorder %v1575_v17, %v2392_v60  ;;  %v427_v16 = vsub.f32 %v1575_v17, %v2212_v14  ;;  %v1353_v13 = vsel %vm202_vm6, 1.0, %v2516_v15  ;;  %v2541_v7 = vld [vmem:[#allocation16_spill] sm:$0xff]  ;;  %v917_v36 = vld [vmem:[#allocation8 + $0x400] sm:$0xff] }
  0xa6   :  { %1540 = vmatprep.subr.mxu0 %v924_v42  ;;  %v2426_v24 = vadd.f32 %v590_v18, %v582_v56  ;;  %v596_v47 = vrot.slane %v1576_v54, %v1708_v44  ;;  %v708_v55 = vmul.f32 %v706_v63, %v556_v57  ;;  %v1352_v29 = vsel %vm201_vm7, 1.0, %v2516_v15 }
  0xa7   :  { %1541 = vmatpush3.msra.mxu0 %v924_v42  ;;  %v726_v8 = vmul.f32 %v724_v2, %v574_v32  ;;  %v716_v31 = vmul.f32 %v714_v12, %v574_v32  ;;  %v433_v14 = vmul.f32 %v432_v5, %v427_v16  ;;  %v434_v39 = vmul.f32 %v432_v5, %v428_v30  ;;  %v2544_v30 = vld [vmem:[#allocation14_spill] sm:$0xff] }
  0xa8   :  { %1542 = vmatprep.subr.mxu0 %v923_v4  ;;  %v734_v38 = vmul.f32 %v732_v22, %v2426_v24  ;;  %v437_v10 = vsub.f32 %v2392_v60, %v1575_v17  ;;  %v227_v57 = vsub.f32 %v2241_v61, %v1352_v29  ;;  %v438_v35 = vsub.f32 %v2392_v60, %v2021_v1 }
  0xa9   :  { %1543 = vmatpush3.msra.mxu0 %v923_v4  ;;  %v718_v21 = vadd.f32 %v716_v31, %v708_v55  ;;  %v442_v33 = vrot.slane %v2137_v34, %v2531_v11  ;;  %v228_v15 = vsub.f32 %v2370_v6, %v1353_v13  ;;  %v740_v48 = vrot.slane %v70_v50, %v1708_v44  ;;  %v919_v11 = vld [vmem:[#allocation8 + $0x410] sm:$0xff] }
  0xaa   :  { %1544 = vmatprep.subr.mxu0 %v922_v27  ;;  %v736_v43 = vadd.f32 %v734_v38, %v726_v8  ;;  %v604_v26 = vrot.slane %v1576_v54, %v2540_v49  ;;  %v435_v28 = vmul.f32 %v433_v14, %v2262_v9  ;;  %v597_v52 = vmul.f32 %v596_v47, %v2541_v7 }
  0xab   :  { %1545 = vmatpush3.msra.mxu0 %v922_v27  ;;  %v443_v62 = vmul.f32 %v442_v33, %v437_v10  ;;  %v444_v61 = vmul.f32 %v442_v33, %v438_v35  ;;  %v436_v1 = vmul.f32 %v434_v39, %v2386_v20  ;;  %v598_v34 = vmul.f32 %v596_v47, %v2381_v45  ;;  %v2543_v20 = vld [vmem:[#allocation26_spill] sm:$0xff] }
  0xac   :  { %1546 = vmatprep.subr.mxu0 %v921_v41  ;;  %1227 = vmatprep.mubr.f32.mxu1 %v736_v43  ;;  %v605_v6 = vmul.f32 %v604_v26, %v437_v10  ;;  %v748_v60 = vrot.slane %v70_v50, %v2540_v49  ;;  %v606_v9 = vmul.f32 %v604_v26, %v438_v35 }
  0xad   :  { %1547 = vmatpush3.msra.mxu0 %v921_v41  ;;  %1228 = vmatmul.mubr.f32.gmra.mxu1 %v718_v21  ;;  %v445_v44 = vmul.f32 %v443_v62, %v227_v57  ;;  %v446_v59 = vmul.f32 %v444_v61, %v228_v15  ;;  %v599_v46 = vmul.f32 %v597_v52, %v2542_v0 }
  0xae   :  { %1548 = vmatprep.subr.mxu0 %v920_v19  ;;  %v741_v25 = vmul.f32 %v740_v48, %v2543_v20  ;;  %v600_v45 = vmul.f32 %v598_v34, %v2407_v40  ;;  %v742_v53 = vmul.f32 %v740_v48, %v2374_v23  ;;  %v749_v5 = vmul.f32 %v748_v60, %v437_v10 }
  0xaf   :  { %1549 = vmatpush3.msra.mxu0 %v920_v19  ;;  %v447_v51 = vadd.f32 %v445_v44, %v435_v28  ;;  %v448_v37 = vadd.f32 %v446_v59, %v436_v1  ;;  %v750_v3 = vmul.f32 %v748_v60, %v438_v35 }
  0xb0   :  { %1550 = vmatprep.subr.mxu0 %v919_v11  ;;  %v743_v18 = vmul.f32 %v741_v25, %v2544_v30  ;;  %v744_v22 = vmul.f32 %v742_v53, %v2426_v24 }
  0xb1   :  { %1551 = vmatpush3.msra.mxu0 %v919_v11  ;;  %v607_v42 = vmul.f32 %v605_v6, %v447_v51  ;;  %v608_v56 = vmul.f32 %v606_v9, %v448_v37 }
  0xb2   :  { %1552 = vmatprep.subr.mxu0 %v918_v58 }
  0xb3   :  { %1553 = vmatpush3.msra.mxu0 %v918_v58  ;;  %v609_v2 = vadd.f32 %v607_v42, %v599_v46  ;;  %v610_v63 = vadd.f32 %v608_v56, %v600_v45 }
  0xb4   :  { %1554 = vmatprep.subr.mxu0 %v917_v36 }
  0xb5   :  { %1555 = vmatpush3.msra.mxu0 %v917_v36  ;;  %v751_v40 = vmul.f32 %v749_v5, %v609_v2  ;;  %v752_v4 = vmul.f32 %v750_v3, %v610_v63 }
  0xb7   :  { %v753_v23 = vadd.f32 %v751_v40, %v743_v18  ;;  %v754_v32 = vadd.f32 %v752_v4, %v744_v22 }
  0xb9   :  { %1556 = vmatprep.mubr.f32.mxu0 %v753_v23 }
  0xba   :  { %1557 = vmatmul.mubr.f32.vlgmr.msra.gmra.mxu0 %v754_v32 }
 0x124   :  { %v1424_v16 = vpop.f32.mrf.mxu1 }
 0x126   :  { %v1425_v54 = vpop.f32.mrf.mxu1 }
 0x127   :  { %v1426_v21 = vadd.f32 %v1425_v54, %v1424_v16 }
 0x12c   :  { %v1386_v12 = vpop.f32.mrf.mxu0 }
 0x12e   :  { %v1387_v17 = vpop.f32.mrf.mxu0 }
 0x12f   :  { %v1388_v10 = vadd.f32 %v1387_v17, %v1386_v12 }
 0x131   :  { %v1075_v43 = vadd.f32 %v1426_v21, %v1388_v10 }
 0x140   :  { %v1427_v55 = vpop.f32.mrf.mxu1 }
 0x142   :  { %v1428_v50 = vpop.f32.mrf.mxu1 }
 0x143   :  { %v1429_v41 = vadd.f32 %v1428_v50, %v1427_v55 }
 0x14f   :  { %v1389_v13 = vpop.f32.mrf.mxu0 }
 0x151   :  { %v1390_v47 = vpop.f32.mrf.mxu0 }
 0x152   :  { %v1391_v38 = vadd.f32 %v1390_v47, %v1389_v13 }
 0x153   :  { %v1462_v27 = vpop.f32.mrf.mxu0 }
 0x154   :  { %v1080_v33 = vadd.f32 %v1429_v41, %v1391_v38 }
 0x155   :  { %v1463_v8 = vpop.f32.mrf.mxu0 }
 0x156   :  { %v1464_v15 = vadd.f32 %v1463_v8, %v1462_v27 }
 0x158   :  { %v1150_v49 = vadd.f32 %v1464_v15, %v1075_v43 }
 0x159   :  { %v1500_v31 = vpop.f32.mrf.mxu1 }
 0x15b   :  { %v1501_v29 = vpop.f32.mrf.mxu1 }
 0x15c   :  { %v1502_v26 = vadd.f32 %v1501_v29, %v1500_v31 }
 0x15e   :  { %v1225_v7 = vadd.f32 %v1502_v26, %v1150_v49 }
 0x164   :  { %v1465_v24 = vpop.f32.mrf.mxu0 }
 0x166   :  { %v1466_v14 = vpop.f32.mrf.mxu0 }
 0x167   :  { %v1467_v57 = vadd.f32 %v1466_v14, %v1465_v24 }
 0x169   :  { %v1155_v48 = vadd.f32 %v1467_v57, %v1080_v33 }
 0x16d   :  { %v1503_v39 = vpop.f32.mrf.mxu1 }
 0x16f   :  { %v1504_v35 = vpop.f32.mrf.mxu1 }
 0x170   :  { %v1505_v19 = vadd.f32 %v1504_v35, %v1503_v39 }
 0x172   :  { %v1230_v28 = vadd.f32 %v1505_v19, %v1155_v48 }
 0x17a   :  { %v1558_v62 = vpop.f32.mrf.mxu0 }
 0x17b   :  { %v1305_v61 = vadd.f32 %v1558_v62, %v1230_v28 }
 0x17c   :  { %v1299_v52 = vpop.f32.mrf.mxu0 }
 0x17d   :  { %1309 = vst [vmem:[#allocation9 + $0x8] sm:$0xff] %v1305_v61  ;;  %v1300_v1 = vadd.f32 %v1299_v52, %v1225_v7 }
 0x17f   :  { %1308 = vst [vmem:[#allocation9] sm:$0xff] %v1300_v1 }
 0x180   :  { %1648 = shalt.err (!%p1645_p5)
}
 0x181   :  { %1321 = dma.vmem_to_hbm [thread:$0]  %s1316_s2, 256, %s2460_s3, [#allocation5], %s1665_s17, %s1665_s17, %s1666_s18  }
 0x182   :  { %1661 = dma.done.wait [#allocation5], 256  }
 0x183   :  { %1662 = vsyncadd [#allocation5], 4294967040 }
 0x184   :  { %1325 = vsyncpa [#allocation4], 1 }
 0x185   :  { %1326 = vsyncpa [#allocation7], 1 }
 0x186   :  { %1327 = vsyncpa [#allocation5], 1 }

</bundles_post_ra>
